<compile_context>
chip_gen: v5e
topology: v5e:2x2
jax: 0.10.0
libtpu: 0.0.40
codegen_flags: <defaults>
</compile_context>

<pallas_src>
import math

import jax
import jax.numpy as jnp
from jax.experimental import pallas as pl
from jax.experimental.pallas import tpu as pltpu

# ----- small synthetic config (stand-in for bert-base sized CapLM config) -----
VOCAB = 64
VOCAB_PAD = 128          # lane-dense output width (multiple of 128)
HIDDEN = 32
N_HEADS = 4
HEAD_DIM = HIDDEN // N_HEADS
INTERMEDIATE = 64
N_LAYERS = 2
MAX_POS = 64
TYPE_VOCAB = 2
LN_EPS = 1e-12

BATCH = 2
SEQ = 8


# ----------------------------- in-kernel math helpers -----------------------------

def _layernorm(x, g, b, eps=LN_EPS):
    # f32 elementwise math (v5e has no bf16 VPU/EUP path).
    mu = jnp.mean(x, axis=-1, keepdims=True)
    var = jnp.mean(jnp.square(x - mu), axis=-1, keepdims=True)
    return (x - mu) * jax.lax.rsqrt(var + eps) * g + b


def _erf(x):
    # Abramowitz & Stegun 7.1.26 (max abs err ~1.5e-7).  Elementwise-only so it
    # lowers cleanly in Mosaic; gives exact (erf) GELU semantics like HF BERT.
    a1, a2, a3, a4, a5 = 0.254829592, -0.284496736, 1.421413741, -1.453152027, 1.061405429
    p = 0.3275911
    sgn = jnp.where(x < 0.0, -1.0, 1.0)
    ax = jnp.abs(x)
    # divide -> EUP reciprocal (frees the VALU in the largest elementwise region).
    t = pl.reciprocal(1.0 + p * ax, approx=True)
    poly = ((((a5 * t + a4) * t + a3) * t + a2) * t + a1) * t
    return sgn * (1.0 - poly * jnp.exp(-ax * ax))


def _gelu_exact(x):
    return 0.5 * x * (1.0 + _erf(x * (1.0 / math.sqrt(2.0))))


# ----------------------------- fused forward kernel -----------------------------

def caplm_kernel(emb_ref, bpe_ref, bte_ref,
                 eg1_ref, eb1_ref, eg2_ref, eb2_ref,
                 wq_ref, bq_ref, wk_ref, bk_ref, wv_ref, bv_ref,
                 wo_ref, bo_ref, l1g_ref, l1b_ref,
                 w1_ref, b1_ref, w2_ref, b2_ref, l2g_ref, l2b_ref,
                 lmw_ref, lmb_ref,
                 out_ref, h_ref):
    Bt, S, H = h_ref.shape          # per-batch-tile activation (Bt = 1 here)
    BS = Bt * S
    layer = pl.program_id(1)

    # ---- fused embeddings (adds + both LayerNorms), first layer step only ----
    @pl.when(layer == 0)
    def _():
        x = emb_ref[...].astype(jnp.float32)                  # we + pe + te (pre-summed)
        x = _layernorm(x, eg1_ref[...], eb1_ref[...])         # TextEmbeddings LN
        x = x + bpe_ref[...] + bte_ref[...]                   # BertModel pos/type emb
        x = _layernorm(x, eg2_ref[...], eb2_ref[...])         # BertModel embeddings LN
        h_ref[...] = x

    # ---- one transformer layer (this step's weights were pipelined in) ----
    x2 = h_ref[...].reshape(BS, H)                            # f32 residual stream
    x2b = x2.astype(jnp.bfloat16)                             # bf16 MXU operand

    wq = wq_ref[0]; wk = wk_ref[0]; wv = wv_ref[0]; wo = wo_ref[0]   # (NH,H,HD)/(NH,HD,H) bf16
    bq = bq_ref[0]; bk = bk_ref[0]; bv = bv_ref[0]                   # (NH,1,HD) f32

    attn = jnp.zeros((BS, H), jnp.float32)
    # Per-head weights are leading-axis blocks, so no lane-axis slicing / relayout;
    # each head's context folds straight into the output projection (no concat).
    for head in range(N_HEADS):
        qh = (jnp.dot(x2b, wq[head], preferred_element_type=jnp.float32)
              + bq[head]).reshape(Bt, S, HEAD_DIM)            # scale pre-folded into wq/bq
        kh = (jnp.dot(x2b, wk[head], preferred_element_type=jnp.float32)
              + bk[head]).reshape(Bt, S, HEAD_DIM)
        vh = (jnp.dot(x2b, wv[head], preferred_element_type=jnp.float32)
              + bv[head]).reshape(Bt, S, HEAD_DIM)
        s = jnp.einsum('bqd,bkd->bqk', qh.astype(jnp.bfloat16), kh.astype(jnp.bfloat16),
                       preferred_element_type=jnp.float32)
        s = s - jnp.max(s, axis=-1, keepdims=True)            # f32 softmax
        p = jnp.exp(s)
        p = p * pl.reciprocal(jnp.sum(p, axis=-1, keepdims=True), approx=True)
        ctx = jnp.einsum('bqk,bkd->bqd', p.astype(jnp.bfloat16), vh.astype(jnp.bfloat16),
                         preferred_element_type=jnp.float32)  # (Bt,S,HD)
        attn = attn + jnp.dot(ctx.reshape(BS, HEAD_DIM).astype(jnp.bfloat16), wo[head],
                              preferred_element_type=jnp.float32)
    attn = attn + bo_ref[0]

    h1 = _layernorm(x2 + attn, l1g_ref[0], l1b_ref[0])
    ff = _gelu_exact(jnp.dot(h1.astype(jnp.bfloat16), w1_ref[0],
                             preferred_element_type=jnp.float32) + b1_ref[0])
    ff = jnp.dot(ff.astype(jnp.bfloat16), w2_ref[0],
                 preferred_element_type=jnp.float32) + b2_ref[0]
    out2 = _layernorm(h1 + ff, l2g_ref[0], l2b_ref[0])

    h_ref[...] = out2.reshape(Bt, S, H)

    # ---- lm_head fused into the last layer's epilogue (lane-dense 128-wide store) ----
    # NOTE: at a real vocab (30K+), tile lm_w over a vocab grid axis (or a second
    # small pallas_call) instead of one constant VMEM-resident block.
    @pl.when(layer == pl.num_programs(1) - 1)
    def _():
        logits = jnp.dot(out2.astype(jnp.bfloat16), lmw_ref[...],
                         preferred_element_type=jnp.float32) + lmb_ref[...]
        out_ref[...] = logits.reshape(Bt, S, lmw_ref.shape[1]).astype(out_ref.dtype)


# ----------------------------- parameters -----------------------------

def init_params(key):
    std = 0.02
    keys = iter(jax.random.split(key, 24))

    def normal(shape):
        return std * jax.random.normal(next(keys), shape, jnp.float32)

    p = {}
    # outer TextEmbeddings (CapLM.embeddings.embeddings)
    p["word_emb"] = normal((VOCAB, HIDDEN)).at[0].set(0.0)      # padding_idx=0
    p["pos_emb"] = normal((MAX_POS, HIDDEN))
    p["type_emb"] = normal((TYPE_VOCAB, HIDDEN))
    p["emb_ln_g"] = jnp.ones((1, HIDDEN), jnp.float32)
    p["emb_ln_b"] = jnp.zeros((1, HIDDEN), jnp.float32)

    # BertModel's own embedding layer (inputs_embeds path still adds pos/type + LN)
    p["bert_pos_emb"] = normal((MAX_POS, HIDDEN))
    p["bert_type_emb"] = normal((TYPE_VOCAB, HIDDEN))
    p["bert_emb_ln_g"] = jnp.ones((1, HIDDEN), jnp.float32)
    p["bert_emb_ln_b"] = jnp.zeros((1, HIDDEN), jnp.float32)

    # encoder weights stacked along a leading layer axis (single pallas_call,
    # layers as the inner 'arbitrary' grid axis; per-layer blocks pipelined).
    L = N_LAYERS
    p["wq"] = normal((L, HIDDEN, HIDDEN)); p["bq"] = jnp.zeros((L, 1, HIDDEN), jnp.float32)
    p["wk"] = normal((L, HIDDEN, HIDDEN)); p["bk"] = jnp.zeros((L, 1, HIDDEN), jnp.float32)
    p["wv"] = normal((L, HIDDEN, HIDDEN)); p["bv"] = jnp.zeros((L, 1, HIDDEN), jnp.float32)
    p["wo"] = normal((L, HIDDEN, HIDDEN)); p["bo"] = jnp.zeros((L, 1, HIDDEN), jnp.float32)
    p["ln1g"] = jnp.ones((L, 1, HIDDEN), jnp.float32)
    p["ln1b"] = jnp.zeros((L, 1, HIDDEN), jnp.float32)
    p["w1"] = normal((L, HIDDEN, INTERMEDIATE))
    p["b1"] = jnp.zeros((L, 1, INTERMEDIATE), jnp.float32)
    p["w2"] = normal((L, INTERMEDIATE, HIDDEN))
    p["b2"] = jnp.zeros((L, 1, HIDDEN), jnp.float32)
    p["ln2g"] = jnp.ones((L, 1, HIDDEN), jnp.float32)
    p["ln2b"] = jnp.zeros((L, 1, HIDDEN), jnp.float32)

    # lm_head
    p["lm_w"] = normal((HIDDEN, VOCAB))
    p["lm_b"] = jnp.zeros((1, VOCAB), jnp.float32)
    return p


def _prep_weights(params):
    """One-time XLA-side re-layout: per-head Q/K/V/O blocks, attention scale folded
    into wq/bq, matmul weights cast to bf16 (halves DMA bytes + VMEM), lm_head padded
    to a lane-dense 128-wide block.  Biases / LN params stay f32."""
    L, H, NH, HD = N_LAYERS, HIDDEN, N_HEADS, HEAD_DIM
    inv = 1.0 / math.sqrt(HD)

    def heads_out(w):    # (L, H_in, H_out) -> (L, NH, H_in, HD)
        return w.reshape(L, H, NH, HD).transpose(0, 2, 1, 3)

    def heads_bias(b):   # (L, 1, H) -> (L, NH, 1, HD)
        return b.reshape(L, NH, 1, HD)

    wq = heads_out(params["wq"] * inv).astype(jnp.bfloat16)
    bq = heads_bias(params["bq"] * inv)
    wk = heads_out(params["wk"]).astype(jnp.bfloat16)
    bk = heads_bias(params["bk"])
    wv = heads_out(params["wv"]).astype(jnp.bfloat16)
    bv = heads_bias(params["bv"])
    wo = params["wo"].reshape(L, NH, HD, H).astype(jnp.bfloat16)   # per-head rows of Wo

    w1 = params["w1"].astype(jnp.bfloat16)
    w2 = params["w2"].astype(jnp.bfloat16)

    lm_w = jnp.pad(params["lm_w"], ((0, 0), (0, VOCAB_PAD - VOCAB))).astype(jnp.bfloat16)
    lm_b = jnp.pad(params["lm_b"], ((0, 0), (0, VOCAB_PAD - VOCAB)))

    layer_ws = (wq, bq, wk, bk, wv, bv, wo, params["bo"],
                params["ln1g"], params["ln1b"], w1, params["b1"],
                w2, params["b2"], params["ln2g"], params["ln2b"])
    return layer_ws, lm_w, lm_b


# ----------------------------- forward pass -----------------------------

def caplm_forward(params, input_ids, position_ids, token_type_ids=None):
    B, S = input_ids.shape
    if token_type_ids is None:
        token_type_ids = jnp.zeros((B, S), jnp.int32)

    # XLA glue: embedding-table gathers + single pre-sum (1x (B,S,H) input instead of 3).
    emb = (params["word_emb"][input_ids]
           + params["pos_emb"][position_ids]
           + params["type_emb"][token_type_ids])               # (B, S, H)
    bpe = params["bert_pos_emb"][:S]                           # (S, H), bert pos ids 0..S-1
    bte = params["bert_type_emb"][0:1]                         # (1, H), bert token type 0
    # TODO(synk): image branch (ImageEmbeddings) omitted — the reference passes raw
    # integer img_pos_ids / token_type_ids where embeddings are expected; only the
    # img_feat=None path is implemented.

    layer_ws, lm_w, lm_b = _prep_weights(params)

    def const_spec(shape):
        return pl.BlockSpec(tuple(shape), lambda b, l, _n=len(shape): (0,) * _n)

    def batch_spec(shape):
        return pl.BlockSpec((1,) + tuple(shape[1:]),
                            lambda b, l, _n=len(shape): (b,) + (0,) * (_n - 1))

    def layer_spec(a):
        return pl.BlockSpec((1,) + a.shape[1:],
                            lambda b, l, _n=a.ndim: (l,) + (0,) * (_n - 1))

    # NOTE: at bert-base scale, additionally mark the constant-index specs below
    # (embeddings, LN vectors, lm_w/lm_b) pipeline_mode=pl.Buffered(1) and pick
    # 256-aligned row/N tiles so bf16 double-buffered layer weights fit v7x's 64 MiB.
    in_specs = ([batch_spec(emb.shape), const_spec(bpe.shape), const_spec(bte.shape)]
                + [const_spec((1, HIDDEN))] * 4
                + [layer_spec(a) for a in layer_ws]
                + [const_spec(lm_w.shape), const_spec(lm_b.shape)])

    # Grid: batch tiles (parallel -> megacore/v7x 2nd TC) x layers (arbitrary, innermost;
    # the activation scratch is the per-batch-tile accumulator across layers).
    logits_pad = pl.pallas_call(
        caplm_kernel,
        out_shape=jax.ShapeDtypeStruct((B, S, VOCAB_PAD), jnp.float32),
        grid=(B, N_LAYERS),
        in_specs=in_specs,
        out_specs=pl.BlockSpec((1, S, VOCAB_PAD), lambda b, l: (b, 0, 0)),
        scratch_shapes=[pltpu.VMEM((1, S, HIDDEN), jnp.float32)],
        compiler_params=pltpu.CompilerParams(
            dimension_semantics=("parallel", "arbitrary"),
            vmem_limit_bytes=48 * 1024 * 1024),   # v7x-safe (<64 MiB); raise on v5e/v6e at scale
    )(emb, bpe, bte,
      params["emb_ln_g"], params["emb_ln_b"],
      params["bert_emb_ln_g"], params["bert_emb_ln_b"],
      *layer_ws, lm_w, lm_b)

    return logits_pad[:, :, :VOCAB]
    # dropout layers are identity at inference time; no attention_mask (reference
    # passes none, so HF uses an all-ones mask).


if __name__ == "__main__":
    key = jax.random.PRNGKey(0)
    pkey, ikey = jax.random.split(key)
    params = init_params(pkey)

    input_ids = jax.random.randint(ikey, (BATCH, SEQ), 1, VOCAB, dtype=jnp.int32)
    position_ids = jnp.broadcast_to(jnp.arange(SEQ, dtype=jnp.int32), (BATCH, SEQ))

    logits = jax.jit(caplm_forward)(params, input_ids, position_ids)
    logits = jax.block_until_ready(logits)
    assert logits.shape == (BATCH, SEQ, VOCAB)
    assert bool(jnp.all(jnp.isfinite(logits)))
    print("KERNEL_OK")
</pallas_src>

<mosaic_0001>
module attributes {stable_mosaic.version = 11 : i64} {
  func.func @caplm_kernel(%arg0: i32, %arg1: i32, %arg2: memref<1x8x32xf32, #tpu.memory_space<vmem>>, %arg3: memref<8x32xf32, #tpu.memory_space<vmem>>, %arg4: memref<1x32xf32, #tpu.memory_space<vmem>>, %arg5: memref<1x32xf32, #tpu.memory_space<vmem>>, %arg6: memref<1x32xf32, #tpu.memory_space<vmem>>, %arg7: memref<1x32xf32, #tpu.memory_space<vmem>>, %arg8: memref<1x32xf32, #tpu.memory_space<vmem>>, %arg9: memref<1x4x32x8xbf16, #tpu.memory_space<vmem>>, %arg10: memref<1x4x1x8xf32, #tpu.memory_space<vmem>>, %arg11: memref<1x4x32x8xbf16, #tpu.memory_space<vmem>>, %arg12: memref<1x4x1x8xf32, #tpu.memory_space<vmem>>, %arg13: memref<1x4x32x8xbf16, #tpu.memory_space<vmem>>, %arg14: memref<1x4x1x8xf32, #tpu.memory_space<vmem>>, %arg15: memref<1x4x8x32xbf16, #tpu.memory_space<vmem>>, %arg16: memref<1x1x32xf32, #tpu.memory_space<vmem>>, %arg17: memref<1x1x32xf32, #tpu.memory_space<vmem>>, %arg18: memref<1x1x32xf32, #tpu.memory_space<vmem>>, %arg19: memref<1x32x64xbf16, #tpu.memory_space<vmem>>, %arg20: memref<1x1x64xf32, #tpu.memory_space<vmem>>, %arg21: memref<1x64x32xbf16, #tpu.memory_space<vmem>>, %arg22: memref<1x1x32xf32, #tpu.memory_space<vmem>>, %arg23: memref<1x1x32xf32, #tpu.memory_space<vmem>>, %arg24: memref<1x1x32xf32, #tpu.memory_space<vmem>>, %arg25: memref<32x128xbf16, #tpu.memory_space<vmem>>, %arg26: memref<1x128xf32, #tpu.memory_space<vmem>>, %arg27: memref<1x8x128xf32, #tpu.memory_space<vmem>>, %arg28: memref<1x8x32xf32, #tpu.memory_space<vmem>>) attributes {dimension_semantics = [#tpu.dimension_semantics<parallel>, #tpu.dimension_semantics<arbitrary>], iteration_bounds = array<i64: 2, 2>, scalar_prefetch = 0 : i64, scratch_operands = 1 : i64, tpu.core_type = #tpu.core_type<tc>, window_params = [{transform_indices = @transform_0, window_bounds = array<i64: 1, 8, 32>}, {pipeline_mode = #tpu.pipeline_mode<synchronous>, transform_indices = @transform_1, window_bounds = array<i64: 8, 32>}, {pipeline_mode = #tpu.pipeline_mode<synchronous>, transform_indices = @transform_2, window_bounds = array<i64: 1, 32>}, {pipeline_mode = #tpu.pipeline_mode<synchronous>, transform_indices = @transform_3, window_bounds = array<i64: 1, 32>}, {pipeline_mode = #tpu.pipeline_mode<synchronous>, transform_indices = @transform_4, window_bounds = array<i64: 1, 32>}, {pipeline_mode = #tpu.pipeline_mode<synchronous>, transform_indices = @transform_5, window_bounds = array<i64: 1, 32>}, {pipeline_mode = #tpu.pipeline_mode<synchronous>, transform_indices = @transform_6, window_bounds = array<i64: 1, 32>}, {transform_indices = @transform_7, window_bounds = array<i64: 1, 4, 32, 8>}, {transform_indices = @transform_8, window_bounds = array<i64: 1, 4, 1, 8>}, {transform_indices = @transform_9, window_bounds = array<i64: 1, 4, 32, 8>}, {transform_indices = @transform_10, window_bounds = array<i64: 1, 4, 1, 8>}, {transform_indices = @transform_11, window_bounds = array<i64: 1, 4, 32, 8>}, {transform_indices = @transform_12, window_bounds = array<i64: 1, 4, 1, 8>}, {transform_indices = @transform_13, window_bounds = array<i64: 1, 4, 8, 32>}, {transform_indices = @transform_14, window_bounds = array<i64: 1, 1, 32>}, {transform_indices = @transform_15, window_bounds = array<i64: 1, 1, 32>}, {transform_indices = @transform_16, window_bounds = array<i64: 1, 1, 32>}, {transform_indices = @transform_17, window_bounds = array<i64: 1, 32, 64>}, {transform_indices = @transform_18, window_bounds = array<i64: 1, 1, 64>}, {transform_indices = @transform_19, window_bounds = array<i64: 1, 64, 32>}, {transform_indices = @transform_20, window_bounds = array<i64: 1, 1, 32>}, {transform_indices = @transform_21, window_bounds = array<i64: 1, 1, 32>}, {transform_indices = @transform_22, window_bounds = array<i64: 1, 1, 32>}, {pipeline_mode = #tpu.pipeline_mode<synchronous>, transform_indices = @transform_23, window_bounds = array<i64: 32, 128>}, {pipeline_mode = #tpu.pipeline_mode<synchronous>, transform_indices = @transform_24, window_bounds = array<i64: 1, 128>}, {transform_indices = @transform_25, window_bounds = array<i64: 1, 8, 128>}]} {
    %c0_i32 = arith.constant 0 : i32
    %0 = arith.cmpi eq, %arg1, %c0_i32 : i32
    %1 = arith.extui %0 : i1 to i32
    %c0_i32_0 = arith.constant 0 : i32
    %2 = arith.cmpi ne, %1, %c0_i32_0 : i32
    scf.if %2 {
      %c0_121 = arith.constant 0 : index
      %c0_122 = arith.constant 0 : index
      %c0_123 = arith.constant 0 : index
      %324 = vector.load %arg2[%c0_121, %c0_122, %c0_123] : memref<1x8x32xf32, #tpu.memory_space<vmem>>, vector<1x8x32xf32>
      %c0_124 = arith.constant 0 : index
      %c0_125 = arith.constant 0 : index
      %325 = vector.load %arg5[%c0_124, %c0_125] : memref<1x32xf32, #tpu.memory_space<vmem>>, vector<1x32xf32>
      %c0_126 = arith.constant 0 : index
      %c0_127 = arith.constant 0 : index
      %326 = vector.load %arg6[%c0_126, %c0_127] : memref<1x32xf32, #tpu.memory_space<vmem>>, vector<1x32xf32>
      %cst_128 = arith.constant dense<0.000000e+00> : vector<1x8xf32>
      %327 = vector.multi_reduction <add>, %324, %cst_128 [2] : vector<1x8x32xf32> to vector<1x8xf32>
      %328 = vector.shape_cast %327 : vector<1x8xf32> to vector<1x8x1xf32>
      %cst_129 = arith.constant 3.200000e+01 : f32
      %329 = vector.broadcast %cst_129 : f32 to vector<1x8x1xf32>
      %330 = arith.divf %328, %329 : vector<1x8x1xf32>
      %331 = vector.broadcast %330 : vector<1x8x1xf32> to vector<1x8x32xf32>
      %332 = arith.subf %324, %331 : vector<1x8x32xf32>
      %333 = arith.mulf %332, %332 : vector<1x8x32xf32>
      %cst_130 = arith.constant dense<0.000000e+00> : vector<1x8xf32>
      %334 = vector.multi_reduction <add>, %333, %cst_130 [2] : vector<1x8x32xf32> to vector<1x8xf32>
      %335 = vector.shape_cast %334 : vector<1x8xf32> to vector<1x8x1xf32>
      %cst_131 = arith.constant 3.200000e+01 : f32
      %336 = vector.broadcast %cst_131 : f32 to vector<1x8x1xf32>
      %337 = arith.divf %335, %336 : vector<1x8x1xf32>
      %338 = vector.broadcast %330 : vector<1x8x1xf32> to vector<1x8x32xf32>
      %339 = arith.subf %324, %338 : vector<1x8x32xf32>
      %cst_132 = arith.constant 9.99999996E-13 : f32
      %340 = vector.broadcast %cst_132 : f32 to vector<1x8x1xf32>
      %341 = arith.addf %337, %340 : vector<1x8x1xf32>
      %342 = math.rsqrt %341 : vector<1x8x1xf32>
      %343 = vector.broadcast %342 : vector<1x8x1xf32> to vector<1x8x32xf32>
      %344 = arith.mulf %339, %343 : vector<1x8x32xf32>
      %345 = vector.shape_cast %325 : vector<1x32xf32> to vector<1x1x32xf32>
      %346 = vector.broadcast %345 : vector<1x1x32xf32> to vector<1x8x32xf32>
      %347 = arith.mulf %344, %346 : vector<1x8x32xf32>
      %348 = vector.shape_cast %326 : vector<1x32xf32> to vector<1x1x32xf32>
      %349 = vector.broadcast %348 : vector<1x1x32xf32> to vector<1x8x32xf32>
      %350 = arith.addf %347, %349 : vector<1x8x32xf32>
      %c0_133 = arith.constant 0 : index
      %c0_134 = arith.constant 0 : index
      %351 = vector.load %arg3[%c0_133, %c0_134] : memref<8x32xf32, #tpu.memory_space<vmem>>, vector<8x32xf32>
      %352 = vector.shape_cast %351 : vector<8x32xf32> to vector<1x8x32xf32>
      %353 = arith.addf %350, %352 : vector<1x8x32xf32>
      %c0_135 = arith.constant 0 : index
      %c0_136 = arith.constant 0 : index
      %354 = vector.load %arg4[%c0_135, %c0_136] : memref<1x32xf32, #tpu.memory_space<vmem>>, vector<1x32xf32>
      %355 = vector.shape_cast %354 : vector<1x32xf32> to vector<1x1x32xf32>
      %356 = vector.broadcast %355 : vector<1x1x32xf32> to vector<1x8x32xf32>
      %357 = arith.addf %353, %356 : vector<1x8x32xf32>
      %c0_137 = arith.constant 0 : index
      %c0_138 = arith.constant 0 : index
      %358 = vector.load %arg7[%c0_137, %c0_138] : memref<1x32xf32, #tpu.memory_space<vmem>>, vector<1x32xf32>
      %c0_139 = arith.constant 0 : index
      %c0_140 = arith.constant 0 : index
      %359 = vector.load %arg8[%c0_139, %c0_140] : memref<1x32xf32, #tpu.memory_space<vmem>>, vector<1x32xf32>
      %cst_141 = arith.constant dense<0.000000e+00> : vector<1x8xf32>
      %360 = vector.multi_reduction <add>, %357, %cst_141 [2] : vector<1x8x32xf32> to vector<1x8xf32>
      %361 = vector.shape_cast %360 : vector<1x8xf32> to vector<1x8x1xf32>
      %cst_142 = arith.constant 3.200000e+01 : f32
      %362 = vector.broadcast %cst_142 : f32 to vector<1x8x1xf32>
      %363 = arith.divf %361, %362 : vector<1x8x1xf32>
      %364 = vector.broadcast %363 : vector<1x8x1xf32> to vector<1x8x32xf32>
      %365 = arith.subf %357, %364 : vector<1x8x32xf32>
      %366 = arith.mulf %365, %365 : vector<1x8x32xf32>
      %cst_143 = arith.constant dense<0.000000e+00> : vector<1x8xf32>
      %367 = vector.multi_reduction <add>, %366, %cst_143 [2] : vector<1x8x32xf32> to vector<1x8xf32>
      %368 = vector.shape_cast %367 : vector<1x8xf32> to vector<1x8x1xf32>
      %cst_144 = arith.constant 3.200000e+01 : f32
      %369 = vector.broadcast %cst_144 : f32 to vector<1x8x1xf32>
      %370 = arith.divf %368, %369 : vector<1x8x1xf32>
      %371 = vector.broadcast %363 : vector<1x8x1xf32> to vector<1x8x32xf32>
      %372 = arith.subf %357, %371 : vector<1x8x32xf32>
      %cst_145 = arith.constant 9.99999996E-13 : f32
      %373 = vector.broadcast %cst_145 : f32 to vector<1x8x1xf32>
      %374 = arith.addf %370, %373 : vector<1x8x1xf32>
      %375 = math.rsqrt %374 : vector<1x8x1xf32>
      %376 = vector.broadcast %375 : vector<1x8x1xf32> to vector<1x8x32xf32>
      %377 = arith.mulf %372, %376 : vector<1x8x32xf32>
      %378 = vector.shape_cast %358 : vector<1x32xf32> to vector<1x1x32xf32>
      %379 = vector.broadcast %378 : vector<1x1x32xf32> to vector<1x8x32xf32>
      %380 = arith.mulf %377, %379 : vector<1x8x32xf32>
      %381 = vector.shape_cast %359 : vector<1x32xf32> to vector<1x1x32xf32>
      %382 = vector.broadcast %381 : vector<1x1x32xf32> to vector<1x8x32xf32>
      %383 = arith.addf %380, %382 : vector<1x8x32xf32>
      %c0_146 = arith.constant 0 : index
      %c0_147 = arith.constant 0 : index
      %c0_148 = arith.constant 0 : index
      %384 = vector.load %arg28[%c0_146, %c0_147, %c0_148] : memref<1x8x32xf32, #tpu.memory_space<vmem>>, vector<1x8x32xf32>
      tpu.vector_store %arg28[%c0_146, %c0_147, %c0_148], %383 {strides = array<i32>} : memref<1x8x32xf32, #tpu.memory_space<vmem>>, vector<1x8x32xf32>,
    } else {
    }
    %c0 = arith.constant 0 : index
    %c0_1 = arith.constant 0 : index
    %c0_2 = arith.constant 0 : index
    %3 = vector.load %arg28[%c0, %c0_1, %c0_2] : memref<1x8x32xf32, #tpu.memory_space<vmem>>, vector<1x8x32xf32>
    %4 = vector.shape_cast %3 : vector<1x8x32xf32> to vector<8x32xf32>
    %5 = arith.truncf %4 : vector<8x32xf32> to vector<8x32xbf16>
    %c0_3 = arith.constant 0 : index
    %c0_4 = arith.constant 0 : index
    %c0_5 = arith.constant 0 : index
    %c0_6 = arith.constant 0 : index
    %6 = vector.load %arg9[%c0_3, %c0_4, %c0_5, %c0_6] : memref<1x4x32x8xbf16, #tpu.memory_space<vmem>>, vector<1x4x32x8xbf16>
    %7 = vector.shape_cast %6 : vector<1x4x32x8xbf16> to vector<4x32x8xbf16>
    %c0_7 = arith.constant 0 : index
    %c0_8 = arith.constant 0 : index
    %c0_9 = arith.constant 0 : index
    %c0_10 = arith.constant 0 : index
    %8 = vector.load %arg11[%c0_7, %c0_8, %c0_9, %c0_10] : memref<1x4x32x8xbf16, #tpu.memory_space<vmem>>, vector<1x4x32x8xbf16>
    %9 = vector.shape_cast %8 : vector<1x4x32x8xbf16> to vector<4x32x8xbf16>
    %c0_11 = arith.constant 0 : index
    %c0_12 = arith.constant 0 : index
    %c0_13 = arith.constant 0 : index
    %c0_14 = arith.constant 0 : index
    %10 = vector.load %arg13[%c0_11, %c0_12, %c0_13, %c0_14] : memref<1x4x32x8xbf16, #tpu.memory_space<vmem>>, vector<1x4x32x8xbf16>
    %11 = vector.shape_cast %10 : vector<1x4x32x8xbf16> to vector<4x32x8xbf16>
    %c0_15 = arith.constant 0 : index
    %c0_16 = arith.constant 0 : index
    %c0_17 = arith.constant 0 : index
    %c0_18 = arith.constant 0 : index
    %12 = vector.load %arg15[%c0_15, %c0_16, %c0_17, %c0_18] : memref<1x4x8x32xbf16, #tpu.memory_space<vmem>>, vector<1x4x8x32xbf16>
    %13 = vector.shape_cast %12 : vector<1x4x8x32xbf16> to vector<4x8x32xbf16>
    %c0_19 = arith.constant 0 : index
    %c0_20 = arith.constant 0 : index
    %c0_21 = arith.constant 0 : index
    %c0_22 = arith.constant 0 : index
    %14 = vector.load %arg10[%c0_19, %c0_20, %c0_21, %c0_22] : memref<1x4x1x8xf32, #tpu.memory_space<vmem>>, vector<1x4x1x8xf32>
    %15 = vector.shape_cast %14 : vector<1x4x1x8xf32> to vector<4x1x8xf32>
    %c0_23 = arith.constant 0 : index
    %c0_24 = arith.constant 0 : index
    %c0_25 = arith.constant 0 : index
    %c0_26 = arith.constant 0 : index
    %16 = vector.load %arg12[%c0_23, %c0_24, %c0_25, %c0_26] : memref<1x4x1x8xf32, #tpu.memory_space<vmem>>, vector<1x4x1x8xf32>
    %17 = vector.shape_cast %16 : vector<1x4x1x8xf32> to vector<4x1x8xf32>
    %c0_27 = arith.constant 0 : index
    %c0_28 = arith.constant 0 : index
    %c0_29 = arith.constant 0 : index
    %c0_30 = arith.constant 0 : index
    %18 = vector.load %arg14[%c0_27, %c0_28, %c0_29, %c0_30] : memref<1x4x1x8xf32, #tpu.memory_space<vmem>>, vector<1x4x1x8xf32>
    %19 = vector.shape_cast %18 : vector<1x4x1x8xf32> to vector<4x1x8xf32>
    %cst = arith.constant 0.000000e+00 : f32
    %20 = vector.broadcast %cst : f32 to vector<8x32xf32>
    %21 = vector.extract_strided_slice %7 {offsets = [0, 0, 0], sizes = [1, 32, 8], strides = [1, 1, 1]} : vector<4x32x8xbf16> to vector<1x32x8xbf16>
    %22 = vector.shape_cast %21 : vector<1x32x8xbf16> to vector<32x8xbf16>
    %cst_31 = arith.constant dense<0.000000e+00> : vector<8x8xf32>
    %23 = tpu.matmul %5, %22, %cst_31 {dimension_numbers = #tpu.dot_dimension_numbers<[1], [0], [0], [1], [0, 0, 1, 1], [], []>} : vector<8x32xbf16>, vector<32x8xbf16>, vector<8x8xf32> -> vector<8x8xf32>
    %24 = vector.extract_strided_slice %15 {offsets = [0, 0, 0], sizes = [1, 1, 8], strides = [1, 1, 1]} : vector<4x1x8xf32> to vector<1x1x8xf32>
    %25 = vector.shape_cast %24 : vector<1x1x8xf32> to vector<1x8xf32>
    %26 = vector.broadcast %25 : vector<1x8xf32> to vector<8x8xf32>
    %27 = arith.addf %23, %26 : vector<8x8xf32>
    %28 = vector.shape_cast %27 : vector<8x8xf32> to vector<1x8x8xf32>
    %29 = vector.extract_strided_slice %9 {offsets = [0, 0, 0], sizes = [1, 32, 8], strides = [1, 1, 1]} : vector<4x32x8xbf16> to vector<1x32x8xbf16>
    %30 = vector.shape_cast %29 : vector<1x32x8xbf16> to vector<32x8xbf16>
    %cst_32 = arith.constant dense<0.000000e+00> : vector<8x8xf32>
    %31 = tpu.matmul %5, %30, %cst_32 {dimension_numbers = #tpu.dot_dimension_numbers<[1], [0], [0], [1], [0, 0, 1, 1], [], []>} : vector<8x32xbf16>, vector<32x8xbf16>, vector<8x8xf32> -> vector<8x8xf32>
    %32 = vector.extract_strided_slice %17 {offsets = [0, 0, 0], sizes = [1, 1, 8], strides = [1, 1, 1]} : vector<4x1x8xf32> to vector<1x1x8xf32>
    %33 = vector.shape_cast %32 : vector<1x1x8xf32> to vector<1x8xf32>
    %34 = vector.broadcast %33 : vector<1x8xf32> to vector<8x8xf32>
    %35 = arith.addf %31, %34 : vector<8x8xf32>
    %36 = vector.shape_cast %35 : vector<8x8xf32> to vector<1x8x8xf32>
    %37 = vector.extract_strided_slice %11 {offsets = [0, 0, 0], sizes = [1, 32, 8], strides = [1, 1, 1]} : vector<4x32x8xbf16> to vector<1x32x8xbf16>
    %38 = vector.shape_cast %37 : vector<1x32x8xbf16> to vector<32x8xbf16>
    %cst_33 = arith.constant dense<0.000000e+00> : vector<8x8xf32>
    %39 = tpu.matmul %5, %38, %cst_33 {dimension_numbers = #tpu.dot_dimension_numbers<[1], [0], [0], [1], [0, 0, 1, 1], [], []>} : vector<8x32xbf16>, vector<32x8xbf16>, vector<8x8xf32> -> vector<8x8xf32>
    %40 = vector.extract_strided_slice %19 {offsets = [0, 0, 0], sizes = [1, 1, 8], strides = [1, 1, 1]} : vector<4x1x8xf32> to vector<1x1x8xf32>
    %41 = vector.shape_cast %40 : vector<1x1x8xf32> to vector<1x8xf32>
    %42 = vector.broadcast %41 : vector<1x8xf32> to vector<8x8xf32>
    %43 = arith.addf %39, %42 : vector<8x8xf32>
    %44 = vector.shape_cast %43 : vector<8x8xf32> to vector<1x8x8xf32>
    %45 = arith.truncf %28 : vector<1x8x8xf32> to vector<1x8x8xbf16>
    %46 = arith.truncf %36 : vector<1x8x8xf32> to vector<1x8x8xbf16>
    "tpu.trace_start"() <{level = 10 : i32, message = "bqd,bkd->bqk"}> : () -> ()
    %cst_34 = arith.constant dense<0.000000e+00> : vector<1x8x8xf32>
    %47 = tpu.matmul %45, %46, %cst_34 {dimension_numbers = #tpu.dot_dimension_numbers<[2], [2], [1], [1], [0, 0, 0, 1, 1, 1], [0], [0]>} : vector<1x8x8xbf16>, vector<1x8x8xbf16>, vector<1x8x8xf32> -> vector<1x8x8xf32>
    "tpu.trace_stop"() : () -> ()
    %cst_35 = arith.constant dense<0xFF800000> : vector<1x8xf32>
    %48 = vector.multi_reduction <maximumf>, %47, %cst_35 [2] : vector<1x8x8xf32> to vector<1x8xf32>
    %49 = vector.shape_cast %48 : vector<1x8xf32> to vector<1x8x1xf32>
    %50 = vector.broadcast %49 : vector<1x8x1xf32> to vector<1x8x8xf32>
    %51 = arith.subf %47, %50 : vector<1x8x8xf32>
    %52 = math.exp %51 : vector<1x8x8xf32>
    %cst_36 = arith.constant dense<0.000000e+00> : vector<1x8xf32>
    %53 = vector.multi_reduction <add>, %52, %cst_36 [2] : vector<1x8x8xf32> to vector<1x8xf32>
    %54 = vector.shape_cast %53 : vector<1x8xf32> to vector<1x8x1xf32>
    %55 = tpu.reciprocal %54 {approx = true} : vector<1x8x1xf32> -> vector<1x8x1xf32>
    %56 = vector.broadcast %55 : vector<1x8x1xf32> to vector<1x8x8xf32>
    %57 = arith.mulf %52, %56 : vector<1x8x8xf32>
    %58 = arith.truncf %57 : vector<1x8x8xf32> to vector<1x8x8xbf16>
    %59 = arith.truncf %44 : vector<1x8x8xf32> to vector<1x8x8xbf16>
    "tpu.trace_start"() <{level = 10 : i32, message = "bqk,bkd->bqd"}> : () -> ()
    %cst_37 = arith.constant dense<0.000000e+00> : vector<1x8x8xf32>
    %60 = tpu.matmul %58, %59, %cst_37 {dimension_numbers = #tpu.dot_dimension_numbers<[2], [1], [1], [2], [0, 0, 0, 1, 1, 2], [0], [0]>} : vector<1x8x8xbf16>, vector<1x8x8xbf16>, vector<1x8x8xf32> -> vector<1x8x8xf32>
    "tpu.trace_stop"() : () -> ()
    %61 = vector.shape_cast %60 : vector<1x8x8xf32> to vector<8x8xf32>
    %62 = arith.truncf %61 : vector<8x8xf32> to vector<8x8xbf16>
    %63 = vector.extract_strided_slice %13 {offsets = [0, 0, 0], sizes = [1, 8, 32], strides = [1, 1, 1]} : vector<4x8x32xbf16> to vector<1x8x32xbf16>
    %64 = vector.shape_cast %63 : vector<1x8x32xbf16> to vector<8x32xbf16>
    %cst_38 = arith.constant dense<0.000000e+00> : vector<8x32xf32>
    %65 = tpu.matmul %62, %64, %cst_38 {dimension_numbers = #tpu.dot_dimension_numbers<[1], [0], [0], [1], [0, 0, 1, 1], [], []>} : vector<8x8xbf16>, vector<8x32xbf16>, vector<8x32xf32> -> vector<8x32xf32>
    %66 = arith.addf %20, %65 : vector<8x32xf32>
    %67 = vector.extract_strided_slice %7 {offsets = [1, 0, 0], sizes = [1, 32, 8], strides = [1, 1, 1]} : vector<4x32x8xbf16> to vector<1x32x8xbf16>
    %68 = vector.shape_cast %67 : vector<1x32x8xbf16> to vector<32x8xbf16>
    %cst_39 = arith.constant dense<0.000000e+00> : vector<8x8xf32>
    %69 = tpu.matmul %5, %68, %cst_39 {dimension_numbers = #tpu.dot_dimension_numbers<[1], [0], [0], [1], [0, 0, 1, 1], [], []>} : vector<8x32xbf16>, vector<32x8xbf16>, vector<8x8xf32> -> vector<8x8xf32>
    %70 = vector.extract_strided_slice %15 {offsets = [1, 0, 0], sizes = [1, 1, 8], strides = [1, 1, 1]} : vector<4x1x8xf32> to vector<1x1x8xf32>
    %71 = vector.shape_cast %70 : vector<1x1x8xf32> to vector<1x8xf32>
    %72 = vector.broadcast %71 : vector<1x8xf32> to vector<8x8xf32>
    %73 = arith.addf %69, %72 : vector<8x8xf32>
    %74 = vector.shape_cast %73 : vector<8x8xf32> to vector<1x8x8xf32>
    %75 = vector.extract_strided_slice %9 {offsets = [1, 0, 0], sizes = [1, 32, 8], strides = [1, 1, 1]} : vector<4x32x8xbf16> to vector<1x32x8xbf16>
    %76 = vector.shape_cast %75 : vector<1x32x8xbf16> to vector<32x8xbf16>
    %cst_40 = arith.constant dense<0.000000e+00> : vector<8x8xf32>
    %77 = tpu.matmul %5, %76, %cst_40 {dimension_numbers = #tpu.dot_dimension_numbers<[1], [0], [0], [1], [0, 0, 1, 1], [], []>} : vector<8x32xbf16>, vector<32x8xbf16>, vector<8x8xf32> -> vector<8x8xf32>
    %78 = vector.extract_strided_slice %17 {offsets = [1, 0, 0], sizes = [1, 1, 8], strides = [1, 1, 1]} : vector<4x1x8xf32> to vector<1x1x8xf32>
    %79 = vector.shape_cast %78 : vector<1x1x8xf32> to vector<1x8xf32>
    %80 = vector.broadcast %79 : vector<1x8xf32> to vector<8x8xf32>
    %81 = arith.addf %77, %80 : vector<8x8xf32>
    %82 = vector.shape_cast %81 : vector<8x8xf32> to vector<1x8x8xf32>
    %83 = vector.extract_strided_slice %11 {offsets = [1, 0, 0], sizes = [1, 32, 8], strides = [1, 1, 1]} : vector<4x32x8xbf16> to vector<1x32x8xbf16>
    %84 = vector.shape_cast %83 : vector<1x32x8xbf16> to vector<32x8xbf16>
    %cst_41 = arith.constant dense<0.000000e+00> : vector<8x8xf32>
    %85 = tpu.matmul %5, %84, %cst_41 {dimension_numbers = #tpu.dot_dimension_numbers<[1], [0], [0], [1], [0, 0, 1, 1], [], []>} : vector<8x32xbf16>, vector<32x8xbf16>, vector<8x8xf32> -> vector<8x8xf32>
    %86 = vector.extract_strided_slice %19 {offsets = [1, 0, 0], sizes = [1, 1, 8], strides = [1, 1, 1]} : vector<4x1x8xf32> to vector<1x1x8xf32>
    %87 = vector.shape_cast %86 : vector<1x1x8xf32> to vector<1x8xf32>
    %88 = vector.broadcast %87 : vector<1x8xf32> to vector<8x8xf32>
    %89 = arith.addf %85, %88 : vector<8x8xf32>
    %90 = vector.shape_cast %89 : vector<8x8xf32> to vector<1x8x8xf32>
    %91 = arith.truncf %74 : vector<1x8x8xf32> to vector<1x8x8xbf16>
    %92 = arith.truncf %82 : vector<1x8x8xf32> to vector<1x8x8xbf16>
    "tpu.trace_start"() <{level = 10 : i32, message = "bqd,bkd->bqk"}> : () -> ()
    %cst_42 = arith.constant dense<0.000000e+00> : vector<1x8x8xf32>
    %93 = tpu.matmul %91, %92, %cst_42 {dimension_numbers = #tpu.dot_dimension_numbers<[2], [2], [1], [1], [0, 0, 0, 1, 1, 1], [0], [0]>} : vector<1x8x8xbf16>, vector<1x8x8xbf16>, vector<1x8x8xf32> -> vector<1x8x8xf32>
    "tpu.trace_stop"() : () -> ()
    %cst_43 = arith.constant dense<0xFF800000> : vector<1x8xf32>
    %94 = vector.multi_reduction <maximumf>, %93, %cst_43 [2] : vector<1x8x8xf32> to vector<1x8xf32>
    %95 = vector.shape_cast %94 : vector<1x8xf32> to vector<1x8x1xf32>
    %96 = vector.broadcast %95 : vector<1x8x1xf32> to vector<1x8x8xf32>
    %97 = arith.subf %93, %96 : vector<1x8x8xf32>
    %98 = math.exp %97 : vector<1x8x8xf32>
    %cst_44 = arith.constant dense<0.000000e+00> : vector<1x8xf32>
    %99 = vector.multi_reduction <add>, %98, %cst_44 [2] : vector<1x8x8xf32> to vector<1x8xf32>
    %100 = vector.shape_cast %99 : vector<1x8xf32> to vector<1x8x1xf32>
    %101 = tpu.reciprocal %100 {approx = true} : vector<1x8x1xf32> -> vector<1x8x1xf32>
    %102 = vector.broadcast %101 : vector<1x8x1xf32> to vector<1x8x8xf32>
    %103 = arith.mulf %98, %102 : vector<1x8x8xf32>
    %104 = arith.truncf %103 : vector<1x8x8xf32> to vector<1x8x8xbf16>
    %105 = arith.truncf %90 : vector<1x8x8xf32> to vector<1x8x8xbf16>
    "tpu.trace_start"() <{level = 10 : i32, message = "bqk,bkd->bqd"}> : () -> ()
    %cst_45 = arith.constant dense<0.000000e+00> : vector<1x8x8xf32>
    %106 = tpu.matmul %104, %105, %cst_45 {dimension_numbers = #tpu.dot_dimension_numbers<[2], [1], [1], [2], [0, 0, 0, 1, 1, 2], [0], [0]>} : vector<1x8x8xbf16>, vector<1x8x8xbf16>, vector<1x8x8xf32> -> vector<1x8x8xf32>
    "tpu.trace_stop"() : () -> ()
    %107 = vector.shape_cast %106 : vector<1x8x8xf32> to vector<8x8xf32>
    %108 = arith.truncf %107 : vector<8x8xf32> to vector<8x8xbf16>
    %109 = vector.extract_strided_slice %13 {offsets = [1, 0, 0], sizes = [1, 8, 32], strides = [1, 1, 1]} : vector<4x8x32xbf16> to vector<1x8x32xbf16>
    %110 = vector.shape_cast %109 : vector<1x8x32xbf16> to vector<8x32xbf16>
    %cst_46 = arith.constant dense<0.000000e+00> : vector<8x32xf32>
    %111 = tpu.matmul %108, %110, %cst_46 {dimension_numbers = #tpu.dot_dimension_numbers<[1], [0], [0], [1], [0, 0, 1, 1], [], []>} : vector<8x8xbf16>, vector<8x32xbf16>, vector<8x32xf32> -> vector<8x32xf32>
    %112 = arith.addf %66, %111 : vector<8x32xf32>
    %113 = vector.extract_strided_slice %7 {offsets = [2, 0, 0], sizes = [1, 32, 8], strides = [1, 1, 1]} : vector<4x32x8xbf16> to vector<1x32x8xbf16>
    %114 = vector.shape_cast %113 : vector<1x32x8xbf16> to vector<32x8xbf16>
    %cst_47 = arith.constant dense<0.000000e+00> : vector<8x8xf32>
    %115 = tpu.matmul %5, %114, %cst_47 {dimension_numbers = #tpu.dot_dimension_numbers<[1], [0], [0], [1], [0, 0, 1, 1], [], []>} : vector<8x32xbf16>, vector<32x8xbf16>, vector<8x8xf32> -> vector<8x8xf32>
    %116 = vector.extract_strided_slice %15 {offsets = [2, 0, 0], sizes = [1, 1, 8], strides = [1, 1, 1]} : vector<4x1x8xf32> to vector<1x1x8xf32>
    %117 = vector.shape_cast %116 : vector<1x1x8xf32> to vector<1x8xf32>
    %118 = vector.broadcast %117 : vector<1x8xf32> to vector<8x8xf32>
    %119 = arith.addf %115, %118 : vector<8x8xf32>
    %120 = vector.shape_cast %119 : vector<8x8xf32> to vector<1x8x8xf32>
    %121 = vector.extract_strided_slice %9 {offsets = [2, 0, 0], sizes = [1, 32, 8], strides = [1, 1, 1]} : vector<4x32x8xbf16> to vector<1x32x8xbf16>
    %122 = vector.shape_cast %121 : vector<1x32x8xbf16> to vector<32x8xbf16>
    %cst_48 = arith.constant dense<0.000000e+00> : vector<8x8xf32>
    %123 = tpu.matmul %5, %122, %cst_48 {dimension_numbers = #tpu.dot_dimension_numbers<[1], [0], [0], [1], [0, 0, 1, 1], [], []>} : vector<8x32xbf16>, vector<32x8xbf16>, vector<8x8xf32> -> vector<8x8xf32>
    %124 = vector.extract_strided_slice %17 {offsets = [2, 0, 0], sizes = [1, 1, 8], strides = [1, 1, 1]} : vector<4x1x8xf32> to vector<1x1x8xf32>
    %125 = vector.shape_cast %124 : vector<1x1x8xf32> to vector<1x8xf32>
    %126 = vector.broadcast %125 : vector<1x8xf32> to vector<8x8xf32>
    %127 = arith.addf %123, %126 : vector<8x8xf32>
    %128 = vector.shape_cast %127 : vector<8x8xf32> to vector<1x8x8xf32>
    %129 = vector.extract_strided_slice %11 {offsets = [2, 0, 0], sizes = [1, 32, 8], strides = [1, 1, 1]} : vector<4x32x8xbf16> to vector<1x32x8xbf16>
    %130 = vector.shape_cast %129 : vector<1x32x8xbf16> to vector<32x8xbf16>
    %cst_49 = arith.constant dense<0.000000e+00> : vector<8x8xf32>
    %131 = tpu.matmul %5, %130, %cst_49 {dimension_numbers = #tpu.dot_dimension_numbers<[1], [0], [0], [1], [0, 0, 1, 1], [], []>} : vector<8x32xbf16>, vector<32x8xbf16>, vector<8x8xf32> -> vector<8x8xf32>
    %132 = vector.extract_strided_slice %19 {offsets = [2, 0, 0], sizes = [1, 1, 8], strides = [1, 1, 1]} : vector<4x1x8xf32> to vector<1x1x8xf32>
    %133 = vector.shape_cast %132 : vector<1x1x8xf32> to vector<1x8xf32>
    %134 = vector.broadcast %133 : vector<1x8xf32> to vector<8x8xf32>
    %135 = arith.addf %131, %134 : vector<8x8xf32>
    %136 = vector.shape_cast %135 : vector<8x8xf32> to vector<1x8x8xf32>
    %137 = arith.truncf %120 : vector<1x8x8xf32> to vector<1x8x8xbf16>
    %138 = arith.truncf %128 : vector<1x8x8xf32> to vector<1x8x8xbf16>
    "tpu.trace_start"() <{level = 10 : i32, message = "bqd,bkd->bqk"}> : () -> ()
    %cst_50 = arith.constant dense<0.000000e+00> : vector<1x8x8xf32>
    %139 = tpu.matmul %137, %138, %cst_50 {dimension_numbers = #tpu.dot_dimension_numbers<[2], [2], [1], [1], [0, 0, 0, 1, 1, 1], [0], [0]>} : vector<1x8x8xbf16>, vector<1x8x8xbf16>, vector<1x8x8xf32> -> vector<1x8x8xf32>
    "tpu.trace_stop"() : () -> ()
    %cst_51 = arith.constant dense<0xFF800000> : vector<1x8xf32>
    %140 = vector.multi_reduction <maximumf>, %139, %cst_51 [2] : vector<1x8x8xf32> to vector<1x8xf32>
    %141 = vector.shape_cast %140 : vector<1x8xf32> to vector<1x8x1xf32>
    %142 = vector.broadcast %141 : vector<1x8x1xf32> to vector<1x8x8xf32>
    %143 = arith.subf %139, %142 : vector<1x8x8xf32>
    %144 = math.exp %143 : vector<1x8x8xf32>
    %cst_52 = arith.constant dense<0.000000e+00> : vector<1x8xf32>
    %145 = vector.multi_reduction <add>, %144, %cst_52 [2] : vector<1x8x8xf32> to vector<1x8xf32>
    %146 = vector.shape_cast %145 : vector<1x8xf32> to vector<1x8x1xf32>
    %147 = tpu.reciprocal %146 {approx = true} : vector<1x8x1xf32> -> vector<1x8x1xf32>
    %148 = vector.broadcast %147 : vector<1x8x1xf32> to vector<1x8x8xf32>
    %149 = arith.mulf %144, %148 : vector<1x8x8xf32>
    %150 = arith.truncf %149 : vector<1x8x8xf32> to vector<1x8x8xbf16>
    %151 = arith.truncf %136 : vector<1x8x8xf32> to vector<1x8x8xbf16>
    "tpu.trace_start"() <{level = 10 : i32, message = "bqk,bkd->bqd"}> : () -> ()
    %cst_53 = arith.constant dense<0.000000e+00> : vector<1x8x8xf32>
    %152 = tpu.matmul %150, %151, %cst_53 {dimension_numbers = #tpu.dot_dimension_numbers<[2], [1], [1], [2], [0, 0, 0, 1, 1, 2], [0], [0]>} : vector<1x8x8xbf16>, vector<1x8x8xbf16>, vector<1x8x8xf32> -> vector<1x8x8xf32>
    "tpu.trace_stop"() : () -> ()
    %153 = vector.shape_cast %152 : vector<1x8x8xf32> to vector<8x8xf32>
    %154 = arith.truncf %153 : vector<8x8xf32> to vector<8x8xbf16>
    %155 = vector.extract_strided_slice %13 {offsets = [2, 0, 0], sizes = [1, 8, 32], strides = [1, 1, 1]} : vector<4x8x32xbf16> to vector<1x8x32xbf16>
    %156 = vector.shape_cast %155 : vector<1x8x32xbf16> to vector<8x32xbf16>
    %cst_54 = arith.constant dense<0.000000e+00> : vector<8x32xf32>
    %157 = tpu.matmul %154, %156, %cst_54 {dimension_numbers = #tpu.dot_dimension_numbers<[1], [0], [0], [1], [0, 0, 1, 1], [], []>} : vector<8x8xbf16>, vector<8x32xbf16>, vector<8x32xf32> -> vector<8x32xf32>
    %158 = arith.addf %112, %157 : vector<8x32xf32>
    %159 = vector.extract_strided_slice %7 {offsets = [3, 0, 0], sizes = [1, 32, 8], strides = [1, 1, 1]} : vector<4x32x8xbf16> to vector<1x32x8xbf16>
    %160 = vector.shape_cast %159 : vector<1x32x8xbf16> to vector<32x8xbf16>
    %cst_55 = arith.constant dense<0.000000e+00> : vector<8x8xf32>
    %161 = tpu.matmul %5, %160, %cst_55 {dimension_numbers = #tpu.dot_dimension_numbers<[1], [0], [0], [1], [0, 0, 1, 1], [], []>} : vector<8x32xbf16>, vector<32x8xbf16>, vector<8x8xf32> -> vector<8x8xf32>
    %162 = vector.extract_strided_slice %15 {offsets = [3, 0, 0], sizes = [1, 1, 8], strides = [1, 1, 1]} : vector<4x1x8xf32> to vector<1x1x8xf32>
    %163 = vector.shape_cast %162 : vector<1x1x8xf32> to vector<1x8xf32>
    %164 = vector.broadcast %163 : vector<1x8xf32> to vector<8x8xf32>
    %165 = arith.addf %161, %164 : vector<8x8xf32>
    %166 = vector.shape_cast %165 : vector<8x8xf32> to vector<1x8x8xf32>
    %167 = vector.extract_strided_slice %9 {offsets = [3, 0, 0], sizes = [1, 32, 8], strides = [1, 1, 1]} : vector<4x32x8xbf16> to vector<1x32x8xbf16>
    %168 = vector.shape_cast %167 : vector<1x32x8xbf16> to vector<32x8xbf16>
    %cst_56 = arith.constant dense<0.000000e+00> : vector<8x8xf32>
    %169 = tpu.matmul %5, %168, %cst_56 {dimension_numbers = #tpu.dot_dimension_numbers<[1], [0], [0], [1], [0, 0, 1, 1], [], []>} : vector<8x32xbf16>, vector<32x8xbf16>, vector<8x8xf32> -> vector<8x8xf32>
    %170 = vector.extract_strided_slice %17 {offsets = [3, 0, 0], sizes = [1, 1, 8], strides = [1, 1, 1]} : vector<4x1x8xf32> to vector<1x1x8xf32>
    %171 = vector.shape_cast %170 : vector<1x1x8xf32> to vector<1x8xf32>
    %172 = vector.broadcast %171 : vector<1x8xf32> to vector<8x8xf32>
    %173 = arith.addf %169, %172 : vector<8x8xf32>
    %174 = vector.shape_cast %173 : vector<8x8xf32> to vector<1x8x8xf32>
    %175 = vector.extract_strided_slice %11 {offsets = [3, 0, 0], sizes = [1, 32, 8], strides = [1, 1, 1]} : vector<4x32x8xbf16> to vector<1x32x8xbf16>
    %176 = vector.shape_cast %175 : vector<1x32x8xbf16> to vector<32x8xbf16>
    %cst_57 = arith.constant dense<0.000000e+00> : vector<8x8xf32>
    %177 = tpu.matmul %5, %176, %cst_57 {dimension_numbers = #tpu.dot_dimension_numbers<[1], [0], [0], [1], [0, 0, 1, 1], [], []>} : vector<8x32xbf16>, vector<32x8xbf16>, vector<8x8xf32> -> vector<8x8xf32>
    %178 = vector.extract_strided_slice %19 {offsets = [3, 0, 0], sizes = [1, 1, 8], strides = [1, 1, 1]} : vector<4x1x8xf32> to vector<1x1x8xf32>
    %179 = vector.shape_cast %178 : vector<1x1x8xf32> to vector<1x8xf32>
    %180 = vector.broadcast %179 : vector<1x8xf32> to vector<8x8xf32>
    %181 = arith.addf %177, %180 : vector<8x8xf32>
    %182 = vector.shape_cast %181 : vector<8x8xf32> to vector<1x8x8xf32>
    %183 = arith.truncf %166 : vector<1x8x8xf32> to vector<1x8x8xbf16>
    %184 = arith.truncf %174 : vector<1x8x8xf32> to vector<1x8x8xbf16>
    "tpu.trace_start"() <{level = 10 : i32, message = "bqd,bkd->bqk"}> : () -> ()
    %cst_58 = arith.constant dense<0.000000e+00> : vector<1x8x8xf32>
    %185 = tpu.matmul %183, %184, %cst_58 {dimension_numbers = #tpu.dot_dimension_numbers<[2], [2], [1], [1], [0, 0, 0, 1, 1, 1], [0], [0]>} : vector<1x8x8xbf16>, vector<1x8x8xbf16>, vector<1x8x8xf32> -> vector<1x8x8xf32>
    "tpu.trace_stop"() : () -> ()
    %cst_59 = arith.constant dense<0xFF800000> : vector<1x8xf32>
    %186 = vector.multi_reduction <maximumf>, %185, %cst_59 [2] : vector<1x8x8xf32> to vector<1x8xf32>
    %187 = vector.shape_cast %186 : vector<1x8xf32> to vector<1x8x1xf32>
    %188 = vector.broadcast %187 : vector<1x8x1xf32> to vector<1x8x8xf32>
    %189 = arith.subf %185, %188 : vector<1x8x8xf32>
    %190 = math.exp %189 : vector<1x8x8xf32>
    %cst_60 = arith.constant dense<0.000000e+00> : vector<1x8xf32>
    %191 = vector.multi_reduction <add>, %190, %cst_60 [2] : vector<1x8x8xf32> to vector<1x8xf32>
    %192 = vector.shape_cast %191 : vector<1x8xf32> to vector<1x8x1xf32>
    %193 = tpu.reciprocal %192 {approx = true} : vector<1x8x1xf32> -> vector<1x8x1xf32>
    %194 = vector.broadcast %193 : vector<1x8x1xf32> to vector<1x8x8xf32>
    %195 = arith.mulf %190, %194 : vector<1x8x8xf32>
    %196 = arith.truncf %195 : vector<1x8x8xf32> to vector<1x8x8xbf16>
    %197 = arith.truncf %182 : vector<1x8x8xf32> to vector<1x8x8xbf16>
    "tpu.trace_start"() <{level = 10 : i32, message = "bqk,bkd->bqd"}> : () -> ()
    %cst_61 = arith.constant dense<0.000000e+00> : vector<1x8x8xf32>
    %198 = tpu.matmul %196, %197, %cst_61 {dimension_numbers = #tpu.dot_dimension_numbers<[2], [1], [1], [2], [0, 0, 0, 1, 1, 2], [0], [0]>} : vector<1x8x8xbf16>, vector<1x8x8xbf16>, vector<1x8x8xf32> -> vector<1x8x8xf32>
    "tpu.trace_stop"() : () -> ()
    %199 = vector.shape_cast %198 : vector<1x8x8xf32> to vector<8x8xf32>
    %200 = arith.truncf %199 : vector<8x8xf32> to vector<8x8xbf16>
    %201 = vector.extract_strided_slice %13 {offsets = [3, 0, 0], sizes = [1, 8, 32], strides = [1, 1, 1]} : vector<4x8x32xbf16> to vector<1x8x32xbf16>
    %202 = vector.shape_cast %201 : vector<1x8x32xbf16> to vector<8x32xbf16>
    %cst_62 = arith.constant dense<0.000000e+00> : vector<8x32xf32>
    %203 = tpu.matmul %200, %202, %cst_62 {dimension_numbers = #tpu.dot_dimension_numbers<[1], [0], [0], [1], [0, 0, 1, 1], [], []>} : vector<8x8xbf16>, vector<8x32xbf16>, vector<8x32xf32> -> vector<8x32xf32>
    %204 = arith.addf %158, %203 : vector<8x32xf32>
    %c0_63 = arith.constant 0 : index
    %c0_64 = arith.constant 0 : index
    %c0_65 = arith.constant 0 : index
    %205 = vector.load %arg16[%c0_63, %c0_64, %c0_65] : memref<1x1x32xf32, #tpu.memory_space<vmem>>, vector<1x1x32xf32>
    %206 = vector.shape_cast %205 : vector<1x1x32xf32> to vector<1x32xf32>
    %207 = vector.broadcast %206 : vector<1x32xf32> to vector<8x32xf32>
    %208 = arith.addf %204, %207 : vector<8x32xf32>
    %209 = arith.addf %4, %208 : vector<8x32xf32>
    %c0_66 = arith.constant 0 : index
    %c0_67 = arith.constant 0 : index
    %c0_68 = arith.constant 0 : index
    %210 = vector.load %arg17[%c0_66, %c0_67, %c0_68] : memref<1x1x32xf32, #tpu.memory_space<vmem>>, vector<1x1x32xf32>
    %211 = vector.shape_cast %210 : vector<1x1x32xf32> to vector<1x32xf32>
    %c0_69 = arith.constant 0 : index
    %c0_70 = arith.constant 0 : index
    %c0_71 = arith.constant 0 : index
    %212 = vector.load %arg18[%c0_69, %c0_70, %c0_71] : memref<1x1x32xf32, #tpu.memory_space<vmem>>, vector<1x1x32xf32>
    %213 = vector.shape_cast %212 : vector<1x1x32xf32> to vector<1x32xf32>
    %cst_72 = arith.constant dense<0.000000e+00> : vector<8xf32>
    %214 = vector.multi_reduction <add>, %209, %cst_72 [1] : vector<8x32xf32> to vector<8xf32>
    %215 = vector.shape_cast %214 : vector<8xf32> to vector<8x1xf32>
    %cst_73 = arith.constant 3.200000e+01 : f32
    %216 = vector.broadcast %cst_73 : f32 to vector<8x1xf32>
    %217 = arith.divf %215, %216 : vector<8x1xf32>
    %218 = vector.broadcast %217 : vector<8x1xf32> to vector<8x32xf32>
    %219 = arith.subf %209, %218 : vector<8x32xf32>
    %220 = arith.mulf %219, %219 : vector<8x32xf32>
    %cst_74 = arith.constant dense<0.000000e+00> : vector<8xf32>
    %221 = vector.multi_reduction <add>, %220, %cst_74 [1] : vector<8x32xf32> to vector<8xf32>
    %222 = vector.shape_cast %221 : vector<8xf32> to vector<8x1xf32>
    %cst_75 = arith.constant 3.200000e+01 : f32
    %223 = vector.broadcast %cst_75 : f32 to vector<8x1xf32>
    %224 = arith.divf %222, %223 : vector<8x1xf32>
    %225 = vector.broadcast %217 : vector<8x1xf32> to vector<8x32xf32>
    %226 = arith.subf %209, %225 : vector<8x32xf32>
    %cst_76 = arith.constant 9.99999996E-13 : f32
    %227 = vector.broadcast %cst_76 : f32 to vector<8x1xf32>
    %228 = arith.addf %224, %227 : vector<8x1xf32>
    %229 = math.rsqrt %228 : vector<8x1xf32>
    %230 = vector.broadcast %229 : vector<8x1xf32> to vector<8x32xf32>
    %231 = arith.mulf %226, %230 : vector<8x32xf32>
    %232 = vector.broadcast %211 : vector<1x32xf32> to vector<8x32xf32>
    %233 = arith.mulf %231, %232 : vector<8x32xf32>
    %234 = vector.broadcast %213 : vector<1x32xf32> to vector<8x32xf32>
    %235 = arith.addf %233, %234 : vector<8x32xf32>
    %236 = arith.truncf %235 : vector<8x32xf32> to vector<8x32xbf16>
    %c0_77 = arith.constant 0 : index
    %c0_78 = arith.constant 0 : index
    %c0_79 = arith.constant 0 : index
    %237 = vector.load %arg19[%c0_77, %c0_78, %c0_79] : memref<1x32x64xbf16, #tpu.memory_space<vmem>>, vector<1x32x64xbf16>
    %238 = vector.shape_cast %237 : vector<1x32x64xbf16> to vector<32x64xbf16>
    %cst_80 = arith.constant dense<0.000000e+00> : vector<8x64xf32>
    %239 = tpu.matmul %236, %238, %cst_80 {dimension_numbers = #tpu.dot_dimension_numbers<[1], [0], [0], [1], [0, 0, 1, 1], [], []>} : vector<8x32xbf16>, vector<32x64xbf16>, vector<8x64xf32> -> vector<8x64xf32>
    %c0_81 = arith.constant 0 : index
    %c0_82 = arith.constant 0 : index
    %c0_83 = arith.constant 0 : index
    %240 = vector.load %arg20[%c0_81, %c0_82, %c0_83] : memref<1x1x64xf32, #tpu.memory_space<vmem>>, vector<1x1x64xf32>
    %241 = vector.shape_cast %240 : vector<1x1x64xf32> to vector<1x64xf32>
    %242 = vector.broadcast %241 : vector<1x64xf32> to vector<8x64xf32>
    %243 = arith.addf %239, %242 : vector<8x64xf32>
    %cst_84 = arith.constant 5.000000e-01 : f32
    %244 = vector.broadcast %cst_84 : f32 to vector<8x64xf32>
    %245 = arith.mulf %244, %243 : vector<8x64xf32>
    %cst_85 = arith.constant 0.707106769 : f32
    %246 = vector.broadcast %cst_85 : f32 to vector<8x64xf32>
    %247 = arith.mulf %243, %246 : vector<8x64xf32>
    %cst_86 = arith.constant 0.000000e+00 : f32
    %248 = vector.broadcast %cst_86 : f32 to vector<8x64xf32>
    %249 = arith.cmpf olt, %247, %248 : vector<8x64xf32>
    %cst_87 = arith.constant -1.000000e+00 : f32
    %cst_88 = arith.constant 1.000000e+00 : f32
    %250 = vector.broadcast %cst_87 : f32 to vector<8x64xf32>
    %251 = vector.broadcast %cst_88 : f32 to vector<8x64xf32>
    %252 = arith.select %249, %250, %251 : vector<8x64xi1>, vector<8x64xf32>
    %253 = math.absf %247 : vector<8x64xf32>
    %cst_89 = arith.constant 0.327591091 : f32
    %254 = vector.broadcast %cst_89 : f32 to vector<8x64xf32>
    %255 = arith.mulf %254, %253 : vector<8x64xf32>
    %cst_90 = arith.constant 1.000000e+00 : f32
    %256 = vector.broadcast %cst_90 : f32 to vector<8x64xf32>
    %257 = arith.addf %256, %255 : vector<8x64xf32>
    %258 = tpu.reciprocal %257 {approx = true} : vector<8x64xf32> -> vector<8x64xf32>
    %cst_91 = arith.constant 1.06140542 : f32
    %259 = vector.broadcast %cst_91 : f32 to vector<8x64xf32>
    %260 = arith.mulf %259, %258 : vector<8x64xf32>
    %cst_92 = arith.constant -1.45315206 : f32
    %261 = vector.broadcast %cst_92 : f32 to vector<8x64xf32>
    %262 = arith.addf %260, %261 : vector<8x64xf32>
    %263 = arith.mulf %262, %258 : vector<8x64xf32>
    %cst_93 = arith.constant 1.42141378 : f32
    %264 = vector.broadcast %cst_93 : f32 to vector<8x64xf32>
    %265 = arith.addf %263, %264 : vector<8x64xf32>
    %266 = arith.mulf %265, %258 : vector<8x64xf32>
    %cst_94 = arith.constant -0.284496725 : f32
    %267 = vector.broadcast %cst_94 : f32 to vector<8x64xf32>
    %268 = arith.addf %266, %267 : vector<8x64xf32>
    %269 = arith.mulf %268, %258 : vector<8x64xf32>
    %cst_95 = arith.constant 0.254829586 : f32
    %270 = vector.broadcast %cst_95 : f32 to vector<8x64xf32>
    %271 = arith.addf %269, %270 : vector<8x64xf32>
    %272 = arith.mulf %271, %258 : vector<8x64xf32>
    %cst_96 = arith.constant 0.000000e+00 : f32
    %273 = vector.broadcast %cst_96 : f32 to vector<8x64xf32>
    %274 = arith.subf %273, %253 : vector<8x64xf32>
    %275 = arith.mulf %274, %253 : vector<8x64xf32>
    %276 = math.exp %275 : vector<8x64xf32>
    %277 = arith.mulf %272, %276 : vector<8x64xf32>
    %cst_97 = arith.constant 1.000000e+00 : f32
    %278 = vector.broadcast %cst_97 : f32 to vector<8x64xf32>
    %279 = arith.subf %278, %277 : vector<8x64xf32>
    %280 = arith.mulf %252, %279 : vector<8x64xf32>
    %cst_98 = arith.constant 1.000000e+00 : f32
    %281 = vector.broadcast %cst_98 : f32 to vector<8x64xf32>
    %282 = arith.addf %281, %280 : vector<8x64xf32>
    %283 = arith.mulf %245, %282 : vector<8x64xf32>
    %284 = arith.truncf %283 : vector<8x64xf32> to vector<8x64xbf16>
    %c0_99 = arith.constant 0 : index
    %c0_100 = arith.constant 0 : index
    %c0_101 = arith.constant 0 : index
    %285 = vector.load %arg21[%c0_99, %c0_100, %c0_101] : memref<1x64x32xbf16, #tpu.memory_space<vmem>>, vector<1x64x32xbf16>
    %286 = vector.shape_cast %285 : vector<1x64x32xbf16> to vector<64x32xbf16>
    %cst_102 = arith.constant dense<0.000000e+00> : vector<8x32xf32>
    %287 = tpu.matmul %284, %286, %cst_102 {dimension_numbers = #tpu.dot_dimension_numbers<[1], [0], [0], [1], [0, 0, 1, 1], [], []>} : vector<8x64xbf16>, vector<64x32xbf16>, vector<8x32xf32> -> vector<8x32xf32>
    %c0_103 = arith.constant 0 : index
    %c0_104 = arith.constant 0 : index
    %c0_105 = arith.constant 0 : index
    %288 = vector.load %arg22[%c0_103, %c0_104, %c0_105] : memref<1x1x32xf32, #tpu.memory_space<vmem>>, vector<1x1x32xf32>
    %289 = vector.shape_cast %288 : vector<1x1x32xf32> to vector<1x32xf32>
    %290 = vector.broadcast %289 : vector<1x32xf32> to vector<8x32xf32>
    %291 = arith.addf %287, %290 : vector<8x32xf32>
    %292 = arith.addf %235, %291 : vector<8x32xf32>
    %c0_106 = arith.constant 0 : index
    %c0_107 = arith.constant 0 : index
    %c0_108 = arith.constant 0 : index
    %293 = vector.load %arg23[%c0_106, %c0_107, %c0_108] : memref<1x1x32xf32, #tpu.memory_space<vmem>>, vector<1x1x32xf32>
    %294 = vector.shape_cast %293 : vector<1x1x32xf32> to vector<1x32xf32>
    %c0_109 = arith.constant 0 : index
    %c0_110 = arith.constant 0 : index
    %c0_111 = arith.constant 0 : index
    %295 = vector.load %arg24[%c0_109, %c0_110, %c0_111] : memref<1x1x32xf32, #tpu.memory_space<vmem>>, vector<1x1x32xf32>
    %296 = vector.shape_cast %295 : vector<1x1x32xf32> to vector<1x32xf32>
    %cst_112 = arith.constant dense<0.000000e+00> : vector<8xf32>
    %297 = vector.multi_reduction <add>, %292, %cst_112 [1] : vector<8x32xf32> to vector<8xf32>
    %298 = vector.shape_cast %297 : vector<8xf32> to vector<8x1xf32>
    %cst_113 = arith.constant 3.200000e+01 : f32
    %299 = vector.broadcast %cst_113 : f32 to vector<8x1xf32>
    %300 = arith.divf %298, %299 : vector<8x1xf32>
    %301 = vector.broadcast %300 : vector<8x1xf32> to vector<8x32xf32>
    %302 = arith.subf %292, %301 : vector<8x32xf32>
    %303 = arith.mulf %302, %302 : vector<8x32xf32>
    %cst_114 = arith.constant dense<0.000000e+00> : vector<8xf32>
    %304 = vector.multi_reduction <add>, %303, %cst_114 [1] : vector<8x32xf32> to vector<8xf32>
    %305 = vector.shape_cast %304 : vector<8xf32> to vector<8x1xf32>
    %cst_115 = arith.constant 3.200000e+01 : f32
    %306 = vector.broadcast %cst_115 : f32 to vector<8x1xf32>
    %307 = arith.divf %305, %306 : vector<8x1xf32>
    %308 = vector.broadcast %300 : vector<8x1xf32> to vector<8x32xf32>
    %309 = arith.subf %292, %308 : vector<8x32xf32>
    %cst_116 = arith.constant 9.99999996E-13 : f32
    %310 = vector.broadcast %cst_116 : f32 to vector<8x1xf32>
    %311 = arith.addf %307, %310 : vector<8x1xf32>
    %312 = math.rsqrt %311 : vector<8x1xf32>
    %313 = vector.broadcast %312 : vector<8x1xf32> to vector<8x32xf32>
    %314 = arith.mulf %309, %313 : vector<8x32xf32>
    %315 = vector.broadcast %294 : vector<1x32xf32> to vector<8x32xf32>
    %316 = arith.mulf %314, %315 : vector<8x32xf32>
    %317 = vector.broadcast %296 : vector<1x32xf32> to vector<8x32xf32>
    %318 = arith.addf %316, %317 : vector<8x32xf32>
    %319 = vector.shape_cast %318 : vector<8x32xf32> to vector<1x8x32xf32>
    %c0_117 = arith.constant 0 : index
    %c0_118 = arith.constant 0 : index
    %c0_119 = arith.constant 0 : index
    %320 = vector.load %arg28[%c0_117, %c0_118, %c0_119] : memref<1x8x32xf32, #tpu.memory_space<vmem>>, vector<1x8x32xf32>
    tpu.vector_store %arg28[%c0_117, %c0_118, %c0_119], %319 {strides = array<i32>} : memref<1x8x32xf32, #tpu.memory_space<vmem>>, vector<1x8x32xf32>,
    %c1_i32 = arith.constant 1 : i32
    %321 = arith.cmpi eq, %arg1, %c1_i32 : i32
    %322 = arith.extui %321 : i1 to i32
    %c0_i32_120 = arith.constant 0 : i32
    %323 = arith.cmpi ne, %322, %c0_i32_120 : i32
    scf.if %323 {
      %324 = arith.truncf %318 : vector<8x32xf32> to vector<8x32xbf16>
      %c0_121 = arith.constant 0 : index
      %c0_122 = arith.constant 0 : index
      %325 = vector.load %arg25[%c0_121, %c0_122] : memref<32x128xbf16, #tpu.memory_space<vmem>>, vector<32x128xbf16>
      %cst_123 = arith.constant dense<0.000000e+00> : vector<8x128xf32>
      %326 = tpu.matmul %324, %325, %cst_123 {dimension_numbers = #tpu.dot_dimension_numbers<[1], [0], [0], [1], [0, 0, 1, 1], [], []>} : vector<8x32xbf16>, vector<32x128xbf16>, vector<8x128xf32> -> vector<8x128xf32>
      %c0_124 = arith.constant 0 : index
      %c0_125 = arith.constant 0 : index
      %327 = vector.load %arg26[%c0_124, %c0_125] : memref<1x128xf32, #tpu.memory_space<vmem>>, vector<1x128xf32>
      %328 = vector.broadcast %327 : vector<1x128xf32> to vector<8x128xf32>
      %329 = arith.addf %326, %328 : vector<8x128xf32>
      %330 = vector.shape_cast %329 : vector<8x128xf32> to vector<1x8x128xf32>
      %c0_126 = arith.constant 0 : index
      %c0_127 = arith.constant 0 : index
      %c0_128 = arith.constant 0 : index
      %331 = vector.load %arg27[%c0_126, %c0_127, %c0_128] : memref<1x8x128xf32, #tpu.memory_space<vmem>>, vector<1x8x128xf32>
      tpu.vector_store %arg27[%c0_126, %c0_127, %c0_128], %330 {strides = array<i32>} : memref<1x8x128xf32, #tpu.memory_space<vmem>>, vector<1x8x128xf32>,
    } else {
    }
    return
  }
  func.func @transform_0(%arg0: i32, %arg1: i32) -> (i32, i32, i32) {
    %c0_i32 = arith.constant 0 : i32
    %c0_i32_0 = arith.constant 0 : i32
    %c0_i32_1 = arith.constant 0 : i32
    return %arg0, %c0_i32, %c0_i32_0 : i32, i32, i32
  }
  func.func @transform_1(%arg0: i32, %arg1: i32) -> (i32, i32) {
    %c0_i32 = arith.constant 0 : i32
    %c0_i32_0 = arith.constant 0 : i32
    %c0_i32_1 = arith.constant 0 : i32
    return %c0_i32, %c0_i32_0 : i32, i32
  }
  func.func @transform_2(%arg0: i32, %arg1: i32) -> (i32, i32) {
    %c0_i32 = arith.constant 0 : i32
    %c0_i32_0 = arith.constant 0 : i32
    %c0_i32_1 = arith.constant 0 : i32
    return %c0_i32, %c0_i32_0 : i32, i32
  }
  func.func @transform_3(%arg0: i32, %arg1: i32) -> (i32, i32) {
    %c0_i32 = arith.constant 0 : i32
    %c0_i32_0 = arith.constant 0 : i32
    %c0_i32_1 = arith.constant 0 : i32
    return %c0_i32, %c0_i32_0 : i32, i32
  }
  func.func @transform_4(%arg0: i32, %arg1: i32) -> (i32, i32) {
    %c0_i32 = arith.constant 0 : i32
    %c0_i32_0 = arith.constant 0 : i32
    %c0_i32_1 = arith.constant 0 : i32
    return %c0_i32, %c0_i32_0 : i32, i32
  }
  func.func @transform_5(%arg0: i32, %arg1: i32) -> (i32, i32) {
    %c0_i32 = arith.constant 0 : i32
    %c0_i32_0 = arith.constant 0 : i32
    %c0_i32_1 = arith.constant 0 : i32
    return %c0_i32, %c0_i32_0 : i32, i32
  }
  func.func @transform_6(%arg0: i32, %arg1: i32) -> (i32, i32) {
    %c0_i32 = arith.constant 0 : i32
    %c0_i32_0 = arith.constant 0 : i32
    %c0_i32_1 = arith.constant 0 : i32
    return %c0_i32, %c0_i32_0 : i32, i32
  }
  func.func @transform_7(%arg0: i32, %arg1: i32) -> (i32, i32, i32, i32) {
    %c0_i32 = arith.constant 0 : i32
    %c0_i32_0 = arith.constant 0 : i32
    %c0_i32_1 = arith.constant 0 : i32
    %c0_i32_2 = arith.constant 0 : i32
    return %arg1, %c0_i32, %c0_i32_0, %c0_i32_1 : i32, i32, i32, i32
  }
  func.func @transform_8(%arg0: i32, %arg1: i32) -> (i32, i32, i32, i32) {
    %c0_i32 = arith.constant 0 : i32
    %c0_i32_0 = arith.constant 0 : i32
    %c0_i32_1 = arith.constant 0 : i32
    %c0_i32_2 = arith.constant 0 : i32
    return %arg1, %c0_i32, %c0_i32_0, %c0_i32_1 : i32, i32, i32, i32
  }
  func.func @transform_9(%arg0: i32, %arg1: i32) -> (i32, i32, i32, i32) {
    %c0_i32 = arith.constant 0 : i32
    %c0_i32_0 = arith.constant 0 : i32
    %c0_i32_1 = arith.constant 0 : i32
    %c0_i32_2 = arith.constant 0 : i32
    return %arg1, %c0_i32, %c0_i32_0, %c0_i32_1 : i32, i32, i32, i32
  }
  func.func @transform_10(%arg0: i32, %arg1: i32) -> (i32, i32, i32, i32) {
    %c0_i32 = arith.constant 0 : i32
    %c0_i32_0 = arith.constant 0 : i32
    %c0_i32_1 = arith.constant 0 : i32
    %c0_i32_2 = arith.constant 0 : i32
    return %arg1, %c0_i32, %c0_i32_0, %c0_i32_1 : i32, i32, i32, i32
  }
  func.func @transform_11(%arg0: i32, %arg1: i32) -> (i32, i32, i32, i32) {
    %c0_i32 = arith.constant 0 : i32
    %c0_i32_0 = arith.constant 0 : i32
    %c0_i32_1 = arith.constant 0 : i32
    %c0_i32_2 = arith.constant 0 : i32
    return %arg1, %c0_i32, %c0_i32_0, %c0_i32_1 : i32, i32, i32, i32
  }
  func.func @transform_12(%arg0: i32, %arg1: i32) -> (i32, i32, i32, i32) {
    %c0_i32 = arith.constant 0 : i32
    %c0_i32_0 = arith.constant 0 : i32
    %c0_i32_1 = arith.constant 0 : i32
    %c0_i32_2 = arith.constant 0 : i32
    return %arg1, %c0_i32, %c0_i32_0, %c0_i32_1 : i32, i32, i32, i32
  }
  func.func @transform_13(%arg0: i32, %arg1: i32) -> (i32, i32, i32, i32) {
    %c0_i32 = arith.constant 0 : i32
    %c0_i32_0 = arith.constant 0 : i32
    %c0_i32_1 = arith.constant 0 : i32
    %c0_i32_2 = arith.constant 0 : i32
    return %arg1, %c0_i32, %c0_i32_0, %c0_i32_1 : i32, i32, i32, i32
  }
  func.func @transform_14(%arg0: i32, %arg1: i32) -> (i32, i32, i32) {
    %c0_i32 = arith.constant 0 : i32
    %c0_i32_0 = arith.constant 0 : i32
    %c0_i32_1 = arith.constant 0 : i32
    return %arg1, %c0_i32, %c0_i32_0 : i32, i32, i32
  }
  func.func @transform_15(%arg0: i32, %arg1: i32) -> (i32, i32, i32) {
    %c0_i32 = arith.constant 0 : i32
    %c0_i32_0 = arith.constant 0 : i32
    %c0_i32_1 = arith.constant 0 : i32
    return %arg1, %c0_i32, %c0_i32_0 : i32, i32, i32
  }
  func.func @transform_16(%arg0: i32, %arg1: i32) -> (i32, i32, i32) {
    %c0_i32 = arith.constant 0 : i32
    %c0_i32_0 = arith.constant 0 : i32
    %c0_i32_1 = arith.constant 0 : i32
    return %arg1, %c0_i32, %c0_i32_0 : i32, i32, i32
  }
  func.func @transform_17(%arg0: i32, %arg1: i32) -> (i32, i32, i32) {
    %c0_i32 = arith.constant 0 : i32
    %c0_i32_0 = arith.constant 0 : i32
    %c0_i32_1 = arith.constant 0 : i32
    return %arg1, %c0_i32, %c0_i32_0 : i32, i32, i32
  }
  func.func @transform_18(%arg0: i32, %arg1: i32) -> (i32, i32, i32) {
    %c0_i32 = arith.constant 0 : i32
    %c0_i32_0 = arith.constant 0 : i32
    %c0_i32_1 = arith.constant 0 : i32
    return %arg1, %c0_i32, %c0_i32_0 : i32, i32, i32
  }
  func.func @transform_19(%arg0: i32, %arg1: i32) -> (i32, i32, i32) {
    %c0_i32 = arith.constant 0 : i32
    %c0_i32_0 = arith.constant 0 : i32
    %c0_i32_1 = arith.constant 0 : i32
    return %arg1, %c0_i32, %c0_i32_0 : i32, i32, i32
  }
  func.func @transform_20(%arg0: i32, %arg1: i32) -> (i32, i32, i32) {
    %c0_i32 = arith.constant 0 : i32
    %c0_i32_0 = arith.constant 0 : i32
    %c0_i32_1 = arith.constant 0 : i32
    return %arg1, %c0_i32, %c0_i32_0 : i32, i32, i32
  }
  func.func @transform_21(%arg0: i32, %arg1: i32) -> (i32, i32, i32) {
    %c0_i32 = arith.constant 0 : i32
    %c0_i32_0 = arith.constant 0 : i32
    %c0_i32_1 = arith.constant 0 : i32
    return %arg1, %c0_i32, %c0_i32_0 : i32, i32, i32
  }
  func.func @transform_22(%arg0: i32, %arg1: i32) -> (i32, i32, i32) {
    %c0_i32 = arith.constant 0 : i32
    %c0_i32_0 = arith.constant 0 : i32
    %c0_i32_1 = arith.constant 0 : i32
    return %arg1, %c0_i32, %c0_i32_0 : i32, i32, i32
  }
  func.func @transform_23(%arg0: i32, %arg1: i32) -> (i32, i32) {
    %c0_i32 = arith.constant 0 : i32
    %c0_i32_0 = arith.constant 0 : i32
    %c0_i32_1 = arith.constant 0 : i32
    return %c0_i32, %c0_i32_0 : i32, i32
  }
  func.func @transform_24(%arg0: i32, %arg1: i32) -> (i32, i32) {
    %c0_i32 = arith.constant 0 : i32
    %c0_i32_0 = arith.constant 0 : i32
    %c0_i32_1 = arith.constant 0 : i32
    return %c0_i32, %c0_i32_0 : i32, i32
  }
  func.func @transform_25(%arg0: i32, %arg1: i32) -> (i32, i32, i32) {
    %c0_i32 = arith.constant 0 : i32
    %c0_i32_0 = arith.constant 0 : i32
    %c0_i32_1 = arith.constant 0 : i32
    return %arg0, %c0_i32, %c0_i32_0 : i32, i32, i32
  }
}

</mosaic_0001>

<bundles_post_ra>
// kernel: caplm_forward.1
= control target key start
LH: loop header
LB: loop body
LE: loop exit
PB: predicated region body
PF: predicated region fallthrough
CT: control target
= control target key end

     0   :  { %s3311_s0 = inlined_call_operand.vmem [shape: f32[2,8,32], index: 0, kind: input, shape index: {}]   ;;  %s3312_s1 = inlined_call_operand.vmem [shape: f32[8,32], index: 1, kind: input, shape index: {}]   ;;  %s3313_s2 = inlined_call_operand.vmem [shape: f32[1,32], index: 2, kind: input, shape index: {}]   ;;  %s3314_s3 = inlined_call_operand.vmem [shape: f32[1,32], index: 3, kind: input, shape index: {}]   ;;  %s3315_s4 = inlined_call_operand.vmem [shape: f32[1,32], index: 4, kind: input, shape index: {}]   ;;  %s3316_s5 = inlined_call_operand.vmem [shape: f32[1,32], index: 5, kind: input, shape index: {}]   ;;  %s3317_s6 = inlined_call_operand.vmem [shape: f32[1,32], index: 6, kind: input, shape index: {}]   ;;  %s3318_s7 = inlined_call_operand.vmem [shape: bf16[2,4,32,8], index: 7, kind: input, shape index: {}]   ;;  %s3319_s8 = inlined_call_operand.vmem [shape: f32[2,4,1,8], index: 8, kind: input, shape index: {}]   ;;  %s3320_s9 = inlined_call_operand.vmem [shape: bf16[2,4,32,8], index: 9, kind: input, shape index: {}]   ;;  %s3321_s10 = inlined_call_operand.vmem [shape: f32[2,4,1,8], index: 10, kind: input, shape index: {}]   ;;  %s3322_s11 = inlined_call_operand.vmem [shape: bf16[2,4,32,8], index: 11, kind: input, shape index: {}]   ;;  %s3323_s12 = inlined_call_operand.vmem [shape: f32[2,4,1,8], index: 12, kind: input, shape index: {}]   ;;  %s3324_s13 = inlined_call_operand.vmem [shape: bf16[2,4,8,32], index: 13, kind: input, shape index: {}]   ;;  %s3325_s14 = inlined_call_operand.vmem [shape: f32[2,1,32], index: 14, kind: input, shape index: {}]   ;;  %s3326_s15 = inlined_call_operand.vmem [shape: f32[2,1,32], index: 15, kind: input, shape index: {}]   ;;  %s3327_s16 = inlined_call_operand.vmem [shape: f32[2,1,32], index: 16, kind: input, shape index: {}]   ;;  %s3328_s17 = inlined_call_operand.vmem [shape: bf16[2,32,64], index: 17, kind: input, shape index: {}]   ;;  %s3329_s18 = inlined_call_operand.vmem [shape: f32[2,1,64], index: 18, kind: input, shape index: {}]   ;;  %s3330_s19 = inlined_call_operand.vmem [shape: bf16[2,64,32], index: 19, kind: input, shape index: {}]   ;;  %s3331_s20 = inlined_call_operand.vmem [shape: f32[2,1,32], index: 20, kind: input, shape index: {}]   ;;  %s3332_s21 = inlined_call_operand.vmem [shape: f32[2,1,32], index: 21, kind: input, shape index: {}]   ;;  %s3333_s22 = inlined_call_operand.vmem [shape: f32[2,1,32], index: 22, kind: input, shape index: {}]   ;;  %s3334_s23 = inlined_call_operand.vmem [shape: bf16[32,128], index: 23, kind: input, shape index: {}]   ;;  %s3335_s24 = inlined_call_operand.vmem [shape: f32[1,128], index: 24, kind: input, shape index: {}]   ;;  %s3336_s25 = inlined_call_operand.hbm [shape: f32[2,8,128], index: 25, kind: output, shape index: {}]  }
   0x1   :  { %3357 = sst [smem:[#allocation23_spill]] %s3311_s0 }
   0x2   :  { %3358 = sst [smem:[#allocation24_spill]] %s3312_s1 }
   0x3   :  { %3359 = sst [smem:[#allocation25_spill]] %s3313_s2 }
   0x4   :  { %3360 = sst [smem:[#allocation26_spill]] %s3314_s3 }
   0x5   :  { %3361 = sst [smem:[#allocation27_spill]] %s3315_s4 }
   0x6   :  { %3362 = sst [smem:[#allocation28_spill]] %s3316_s5 }
   0x7   :  { %3363 = sst [smem:[#allocation29_spill]] %s3317_s6 }
   0x8   :  { %3364 = sst [smem:[#allocation30_spill]] %s3318_s7 }
   0x9   :  { %3365 = sst [smem:[#allocation31_spill]] %s3319_s8 }
   0xa   :  { %3366 = sst [smem:[#allocation32_spill]] %s3320_s9 }
   0xb   :  { %3367 = sst [smem:[#allocation33_spill]] %s3321_s10 }
   0xc   :  { %3368 = sst [smem:[#allocation34_spill]] %s3322_s11 }
   0xd   :  { %3369 = sst [smem:[#allocation35_spill]] %s3323_s12 }
   0xe   :  { %3370 = sst [smem:[#allocation36_spill]] %s3324_s13 }
   0xf   :  { %3371 = sst [smem:[#allocation37_spill]] %s3328_s17 }
  0x10   :  { %3372 = sst [smem:[#allocation38_spill]] %s3333_s22 }
  0x11   :  { %3373 = sst [smem:[#allocation39_spill]] %s3334_s23 }
  0x12   :  { %3374 = sst [smem:[#allocation40_spill]] %s3335_s24 }
  0x13   :  { %3375 = sst [smem:[#allocation41_spill]] %s3336_s25 }
  0x14   :  { %30 = vsyncpa [#allocation4], 0 }
  0x15   :  { %32 = vsyncpa [#allocation4 + $0x1], 0  ;;  %s2905_s29 = smov 0   ;;  %s2907_s2 = smov 0  }
  0x16   :  { %s2909_s6 = smov 0   ;;  %s2911_s30 = smov 0  }
  0x17   :  { %s2913_s7 = smov 0   ;;  %s2915_s3 = smov 0  }
  0x18   :  { %s2917_s26 = smov 0   ;;  %s2919_s1 = smov 0  }
  0x19 LB: > { %3376 = sst [smem:[#allocation6_spill]] %s2742_s29  ;;  %s2324_s8 = sadd.s32 4294967295, %s2770_s1   ;;  %s2770_s1 = sphi %s2919_s1, %s38_s1   ;;  %s2766_s26 = sphi %s2917_s26, %s3437_s26   ;;  %s2762_s3 = sphi %s2915_s3, %s3436_s3   ;;  %s2758_s7 = sphi %s2913_s7, %s3435_s7   ;;  %s2754_s30 = sphi %s2911_s30, %s3434_s30   ;;  %s2750_s6 = sphi %s2909_s6, %s3433_s6   ;;  %s2746_s2 = sphi %s2907_s2, %s3432_s2   ;;  %s2742_s29 = sphi %s2905_s29, %s3431_s29  }
  0x1a   : > { %3377 = sst [smem:[#allocation7_spill]] %s2746_s2  ;;  %s2325_s27 = sadd.s32 4294967294, %s2770_s1  }
  0x1b   : > { %3378 = sst [smem:[#allocation8_spill]] %s2750_s6  ;;  %s47_s4 = sadd.s32 1, %s2762_s3 }
  0x1c   : > { %3379 = sst [smem:[#allocation9_spill]] %s2754_s30  ;;  %p48_p0 = scmp.ge.s32.totalorder %s47_s4, 2 }
  0x1d   : > { %3380 = sst [smem:[#allocation10_spill]] %s2758_s7  ;;  %s50_s28 = sadd.s32 1, %s2766_s26 }
  0x1e   : > { %3381 = sst [smem:[#allocation11_spill]] %s2762_s3  ;;  %p677_p1 = scmp.ne.s32.totalorder %s2750_s6, %s2746_s2 }
  0x1f   : > { %3382 = sst [smem:[#allocation12_spill]] %s2766_s26  ;;  %p678_p2 = scmp.eq.s32.totalorder %s2324_s8, 3 }
  0x20   : > { %3383 = sst [smem:[#allocation13_spill]] %s2770_s1  ;;  %s3439_s4 = smov (%p48_p0, %s47_s4), 0 }
  0x21   : > { %3384 = sst [smem:[#allocation14_spill]] %s3439_s4  ;;  %s3441_s28 = smov (!%p48_p0, %s50_s28), %s2766_s26 }
  0x22   : > { %p2954_p3 = por %p678_p2, %p677_p1  ;;  %p683_p4 = scmp.ne.s32.totalorder %s2746_s2, %s2742_s29 }
  0x23   : > { %p52_p5 = scmp.ge.s32.totalorder %s3441_s28, 2  ;;  %p684_p6 = scmp.eq.s32.totalorder %s2325_s27, 3 }
  0x24   : > { %s3385_s9 = scalar_select %p2954_p3, 1, 0 }
  0x25   : > { %p2328_p7 = scmp.ge.s32.totalorder %s2770_s1, 1  ;;  %p844_p8 = scmp.lt.s32.totalorder %s2770_s1, 5 }
  0x26   : > { %3386 = sst [smem:[#allocation15_spill]] %s3385_s9  ;;  %s3443_s28 = smov (%p52_p5, %s3441_s28), 0 }
  0x27   : > { %3387 = sst [smem:[#allocation16_spill]] %s3443_s28  ;;  %p2964_p9 = por %p684_p6, %p683_p4 }
  0x28   : > { %p845_p10 = pnand %p2328_p7, %p844_p8  ;;  %s664_s0 = ssub.s32 %s2766_s26, %s3443_s28 }
  0x29   : > { %s3388_s5 = scalar_select %p2964_p9, 1, 0 }
  0x2a   : > { %s667_s8 = sadd.s32 1, %s2750_s6  ;;  %p665_p11 = scmp.eq.s32.totalorder %s664_s0, 0 }
  0x2b   : > { %3389 = sst [smem:[#allocation17_spill]] %s3388_s5  ;;  %848 = sbr.rel (%p845_p10) target bundleno = 3909 (0xf45), region = 120 }
  0x2c   : > { %s2972_s4 = scalar_select %p665_p11, %s2750_s6, %s667_s8  }
  0x2e   : > { %3390 = sst [smem:[#allocation18_spill]] %s2972_s4 }
  0x30   : > { %s3343_s27 = sand.u32 1, %s2746_s2   ;;  %p974_p12 = scmp.lt.s32.totalorder %s2758_s7, 1 }
  0x31   : > { %s2978_s3 = sshll.u32 %s3343_s27, 3  ;;  %p978_p13 = scmp.lt.s32.totalorder %s2754_s30, 1 }
  0x32   : > { %s975_s5 = scalar_select %p974_p12, %s2758_s7, 1 }
  0x33   : > { %s2983_s29 = scalar_select %p978_p13, %s2754_s30, 1 }
  0x34   : > { %s2330_s0 = sshll.u32 %s975_s5, 3  ;;  %s3391_s26 = sld [smem:[#allocation23_spill]] }
  0x35   : > { %s2507_s6 = sshll.u32 %s2983_s29, 6  ;;  %s3392_s25 = sld [smem:[#allocation30_spill]] }
  0x36   : > { %s2333_s2 = sshll.u32 %s2983_s29, 2  ;;  %s3394_s23 = sld [smem:[#allocation31_spill]] }
  0x37   : > { %s3396_s28 = sld [smem:[#allocation32_spill]]  ;;  %s2510_s22 = sshll.u32 %s2983_s29, 4 }
  0x38   : > { %s3398_s10 = sld [smem:[#allocation33_spill]]  ;;  %s973_s5 = scalar_lea.vmem [#allocation3], %s2978_s3 }
  0x39   : > { %s3400_s11 = sld [smem:[#allocation34_spill]] }
  0x3a   : > { %s977_s4 = scalar_lea.vmem %s3391_s26, %s2330_s0  ;;  %s3401_s12 = sld [smem:[#allocation35_spill]] }
  0x3b   : > { %s2992_s9 = scalar_lea.vmem %s3392_s25, %s2507_s6  ;;  %s3402_s13 = sld [smem:[#allocation36_spill]] }
  0x3c   : > { %3393 = sst [smem:[#allocation19_spill]] %s2992_s9  ;;  %s2998_s30 = scalar_lea.vmem %s3394_s23, %s2333_s2 }
  0x3d   : > { %3395 = sst [smem:[#allocation20_spill]] %s2998_s30  ;;  %s3003_s26 = scalar_lea.vmem %s3396_s28, %s2507_s6 }
  0x3e   : > { %3397 = sst [smem:[#allocation21_spill]] %s3003_s26  ;;  %s3008_s1 = scalar_lea.vmem %s3398_s10, %s2333_s2 }
  0x3f   : > { %3399 = sst [smem:[#allocation22_spill]] %s3008_s1  ;;  %s3013_s9 = scalar_lea.vmem %s3400_s11, %s2507_s6 }
  0x40   : > { %s3018_s7 = scalar_lea.vmem %s3401_s12, %s2333_s2  ;;  %s3403_s17 = sld [smem:[#allocation37_spill]] }
  0x41   : > { %s3024_s30 = scalar_lea.vmem %s3402_s13, %s2510_s22  ;;  %s1026_s12 = scalar_lea.vmem %s3329_s18, %s2983_s29 }
  0x42   : > { %s2512_s13 = sshll.u32 %s2983_s29, 5  ;;  %s1034_s10 = scalar_lea.vmem %s3331_s20, %s2983_s29 }
  0x43   : > { %s3055_s6 = scalar_lea.vmem %s3330_s19, %s2512_s13  ;;  %s1037_s2 = scalar_lea.vmem %s3332_s21, %s2983_s29 }
  0x44   : > { %s3404_s24 = sld [smem:[#allocation38_spill]] }
  0x45   : > { %s3405_s28 = sld [smem:[#allocation9_spill]] }
  0x46   : > { %s3041_s11 = scalar_lea.vmem %s3403_s17, %s2510_s22 }
  0x4a   : > { %s1040_s17 = scalar_lea.vmem %s3404_s24, %s2983_s29 }
  0x4b   : > { %p2346_p0 = scmp.ne.s32.totalorder %s3405_s28, 0 }
  0x4c   : > { %s3406_s24 = sld [smem:[#allocation26_spill]] (!%p2346_p0) }
  0x4d   : > { %1045 = sbr.rel (%p2346_p0) target bundleno = 624 (0x270), region = 124  ;;  %s3407_s26 = sld [smem:[#allocation27_spill]] (!%p2346_p0) }
  0x4e   : > { %s3408_s27 = sld [smem:[#allocation24_spill]] (!%p2346_p0) }
  0x4f   : > { %s3409_s28 = sld [smem:[#allocation25_spill]] (!%p2346_p0) }
  0x52   : > { %v1046_v0 = vld [vmem:[%s977_s4] sm:$0xff]  ;;  %vm1049_vm0 = vcmask 261120   ;;  %v2772_v2 = vmov 32.0  }
  0x53   : > { %v1050_v1 = vsel %vm1049_vm0, %v1046_v0, 0.0  ;;  %2624 = vrcp.f32 %v2772_v2  ;;  %v2619_v23 = vld [vmem:[%s3406_s24] ss:$0 sm:$0xff]  ;;  %s3410_s24 = sld [smem:[#allocation28_spill]] }
  0x54   : > { %1051 = vadd.xlane.f32.xlu0 %v1050_v1  ;;  %v2620_v26 = vld [vmem:[%s3407_s26] ss:$0 sm:$0xff]  ;;  %s3411_s26 = sld [smem:[#allocation29_spill]] }
  0x55   : > { %v1087_v28 = vld [vmem:[%s3408_s27] sm:$0xff] }
  0x56   : > { %v2621_v30 = vld [vmem:[%s3409_s28] ss:$0 sm:$0xff] }
  0x59   : > { %v2625_v3 = vpop.eup %2624  ;;  %v2622_v48 = vld [vmem:[%s3410_s24] ss:$0 sm:$0xff] }
  0x5a   : > { %v1054_v4 = vmul.f32 32.0, %v2625_v3  ;;  %vm1058_vm1 = vweird.f32 %v2625_v3  ;;  %v2623_v50 = vld [vmem:[%s3411_s26] ss:$0 sm:$0xff] }
  0x5c   : > { %v1055_v5 = vsub.f32 1.0, %v1054_v4 }
  0x5e   : > { %v1056_v6 = vmul.f32 %v2625_v3, %v1055_v5 }
  0x60   : > { %v1057_v7 = vadd.f32 %v2625_v3, %v1056_v6 }
  0x62   : > { %v1059_v8 = vsel %vm1058_vm1, %v2625_v3, %v1057_v7 }
  0xc7   : > { %v1052_v9 = vpop.xlane.xlu0 %1051 }
  0xc8   : > { %v1060_v10 = vmul.f32 %v1059_v8, %v1052_v9 }
  0xca   : > { %v1061_v11 = vsub.f32 %v1046_v0, %v1060_v10 }
  0xcc   : > { %v1062_v12 = vmul.f32 %v1061_v11, %v1061_v11 }
  0xce   : > { %v1063_v13 = vsel %vm1049_vm0, %v1062_v12, 0.0 }
  0xcf   : > { %1064 = vadd.xlane.f32.xlu0 %v1063_v13 }
 0x142   : > { %v1065_v14 = vpop.xlane.xlu0 %1064 }
 0x143   : > { %v1066_v15 = vmul.f32 %v1065_v14, %v1059_v8 }
 0x145   : > { %v1067_v16 = vadd.f32 1e-12, %v1066_v15 }
 0x147   : > { %2626 = vrsqrt.f32 %v1067_v16  ;;  %vm1074_vm3 = vweird.f32 %v1067_v16 }
 0x14d   : > { %v2627_v17 = vpop.eup %2626 }
 0x14e   : > { %v1069_v18 = vmul.f32 %v2627_v17, %v1067_v16  ;;  %vm1075_vm2 = vweird.f32 %v2627_v17 }
 0x14f   : > { %vm1076_vm4 = vmor %vm1074_vm3, %vm1075_vm2 }
 0x150   : > { %v1070_v19 = vmul.f32 %v2627_v17, %v1069_v18 }
 0x152   : > { %v1071_v20 = vmul.f32 0.5, %v1070_v19 }
 0x154   : > { %v1072_v21 = vsub.f32 1.5, %v1071_v20 }
 0x156   : > { %v1073_v22 = vmul.f32 %v2627_v17, %v1072_v21 }
 0x158   : > { %v1077_v24 = vsel %vm1076_vm4, %v2627_v17, %v1073_v22 }
 0x159   : > { %v1078_v25 = vmul.f32 %v1077_v24, %v1061_v11 }
 0x15b   : > { %v1082_v27 = vmul.f32 %v2619_v23, %v1078_v25 }
 0x15d   : > { %v1086_v29 = vadd.f32 %v2620_v26, %v1082_v27 }
 0x15f   : > { %v1088_v31 = vadd.f32 %v1087_v28, %v1086_v29 }
 0x161   : > { %v1093_v32 = vadd.f32 %v2621_v30, %v1088_v31 }
 0x163   : > { %v1096_v33 = vsel %vm1049_vm0, %v1093_v32, 0.0 }
 0x164   : > { %1097 = vadd.xlane.f32.xlu1 %v1096_v33 }
 0x1d7   : > { %v1098_v34 = vpop.xlane.xlu1 %1097 }
 0x1d8   : > { %v1099_v35 = vmul.f32 %v1098_v34, %v1059_v8 }
 0x1da   : > { %v1100_v36 = vsub.f32 %v1093_v32, %v1099_v35 }
 0x1dc   : > { %v1101_v37 = vmul.f32 %v1100_v36, %v1100_v36 }
 0x1de   : > { %v1102_v38 = vsel %vm1049_vm0, %v1101_v37, 0.0 }
 0x1df   : > { %1103 = vadd.xlane.f32.xlu1 %v1102_v38 }
 0x252   : > { %v1104_v39 = vpop.xlane.xlu1 %1103 }
 0x253   : > { %v1105_v40 = vmul.f32 %v1104_v39, %v1059_v8 }
 0x255   : > { %v1106_v41 = vadd.f32 1e-12, %v1105_v40 }
 0x257   : > { %2628 = vrsqrt.f32 %v1106_v41  ;;  %vm1113_vm6 = vweird.f32 %v1106_v41 }
 0x25d   : > { %v2629_v42 = vpop.eup %2628 }
 0x25e   : > { %v1108_v43 = vmul.f32 %v2629_v42, %v1106_v41  ;;  %vm1114_vm5 = vweird.f32 %v2629_v42 }
 0x25f   : > { %vm1115_vm7 = vmor %vm1113_vm6, %vm1114_vm5 }
 0x260   : > { %v1109_v44 = vmul.f32 %v2629_v42, %v1108_v43 }
 0x262   : > { %v1110_v45 = vmul.f32 0.5, %v1109_v44 }
 0x264   : > { %v1111_v46 = vsub.f32 1.5, %v1110_v45 }
 0x266   : > { %v1112_v47 = vmul.f32 %v2629_v42, %v1111_v46 }
 0x268   : > { %v1116_v49 = vsel %vm1115_vm7, %v2629_v42, %v1112_v47 }
 0x269   : > { %v1117_v51 = vmul.f32 %v1116_v49, %v1100_v36 }
 0x26b   : > { %v1121_v52 = vmul.f32 %v2622_v48, %v1117_v51 }
 0x26d   : > { %v1125_v53 = vadd.f32 %v2623_v50, %v1121_v52 }
 0x26f   : > { %1126 = vst.msk [vmem:[#allocation2] sm:$0xff] %vm1049_vm0, %v1125_v53 }
 0x270 PF: > { %s3412_s1 = sld [smem:[#allocation19_spill]]  ;;  %vm1208_vm8 = vcmask 261120   ;;  %vm1283_vm9 = vcmask 64512   ;;  %v2530_v7 = vld [vmem:[%s3013_s9 + $0x8] sm:$0xff]  ;;  %v2529_v8 = vld [vmem:[%s3013_s9] sm:$0xff]  ;;  %vm1319_vm10 = vcmask 1043456   ;;  %s3416_s23 = scalar_lea.vmem %s3325_s14, %s2983_s29 }
 0x271   : > { %s3413_s25 = sld [smem:[#allocation21_spill]]  ;;  %1274 = vmatpush.bf16.msra.mxu2 %v2530_v7  ;;  %v2632_v23 = vld [vmem:[%s3018_s7] ss:$0 sm:$0xff]  ;;  %v2532_v35 = vld [vmem:[%s3013_s9 + $0x18] sm:$0xff]  ;;  %v2531_v36 = vld [vmem:[%s3013_s9 + $0x10] sm:$0xff]  ;;  %s3418_s24 = scalar_lea.vmem %s3327_s16, %s2983_s29  ;;  %vm1974_vm0 = vcmask 523264  }
 0x272   : > { %s3414_s27 = sld [smem:[#allocation22_spill]]  ;;  %v1177_v44 = vld [vmem:[%s3024_s30] sm:$0xf] }
 0x273   : > { %s3415_s22 = sld [smem:[#allocation20_spill]]  ;;  %v1498_v45 = vsel %vm1319_vm10, %v1177_v44, 0  ;;  %v2635_v46 = vld [vmem:[%s3018_s7 + $0x1] ss:$0 sm:$0xff] }
 0x275   : > { %1275 = vmatpush.bf16.msra.mxu2 %v2529_v8 }
 0x276   : > { %v2514_v54 = vld [vmem:[%s3412_s1 + $0x8] sm:$0xff]  ;;  %v2513_v56 = vld [vmem:[%s3412_s1] sm:$0xff]  ;;  %v2516_v14 = vld [vmem:[%s3412_s1 + $0x18] sm:$0xff] }
 0x277   : > { %v2522_v55 = vld [vmem:[%s3413_s25 + $0x8] sm:$0xff]  ;;  %v2521_v57 = vld [vmem:[%s3413_s25] sm:$0xff]  ;;  %1218 = vmatpush.bf16.msra.mxu0 %v2514_v54  ;;  %v2524_v9 = vld [vmem:[%s3413_s25 + $0x18] sm:$0xff] }
 0x278   : > { %1246 = vmatpush.bf16.msra.mxu1 %v2522_v55  ;;  %v3094_v58 = vld [vmem:[#allocation2] sm:$0xff]  ;;  %v2523_v13 = vld [vmem:[%s3413_s25 + $0x10] sm:$0xff] }
 0x279   : > { %v3098_v59 = vpack.c.bf16 %v3094_v58, %v3094_v58  ;;  %v2631_v60 = vld [vmem:[%s3414_s27] ss:$0 sm:$0xff]  ;;  %1386 = vmatpush.bf16.msrb.mxu2 %v2524_v9  ;;  %v2515_v15 = vld [vmem:[%s3412_s1 + $0x10] sm:$0xff]  ;;  %v2633_v28 = vld [vmem:[%s3414_s27 + $0x1] ss:$0 sm:$0xff] }
 0x27a   : > { %v2630_v63 = vld [vmem:[%s3415_s22] ss:$0 sm:$0xff]  ;;  %v2634_v41 = vld [vmem:[%s3415_s22 + $0x1] ss:$0 sm:$0xff] }
 0x27b   : > { %1219 = vmatpush.bf16.msra.mxu0 %v2513_v56  ;;  %2373 = vmatmul.msk.bf16.vlgmr.msra.gmra.mxu2 %vm1208_vm8, %v3098_v59 }
 0x27c   : > { %1247 = vmatpush.bf16.msra.mxu1 %v2521_v57 }
 0x27d   : > { %1387 = vmatpush.bf16.msrb.mxu2 %v2523_v13 }
 0x27e   : > { %2355 = vmatmul.msk.bf16.vlgmr.msra.gmra.mxu0 %vm1208_vm8, %v3098_v59 }
 0x27f   : > { %2364 = vmatmul.msk.bf16.vlgmr.msra.gmra.mxu1 %vm1208_vm8, %v3098_v59 }
 0x280   : > { %1358 = vmatpush.bf16.msrb.mxu1 %v2516_v14 }
 0x284   : > { %1359 = vmatpush.bf16.msrb.mxu1 %v2515_v15 }
 0x28b   : > { %2393 = vmatmul.msk.bf16.vlgmr.msrb.gmra.mxu2 %vm1208_vm8, %v3098_v59 }
 0x28f   : > { %2384 = vmatmul.msk.bf16.vlgmr.msrb.gmra.mxu1 %vm1208_vm8, %v3098_v59 }
 0x2fb   : > { %v1221_v61 = vpop.f32.mrf.mxu0 }
 0x2fc   : > { %v1249_v62 = vpop.f32.mrf.mxu1  ;;  %v1222_v2 = vadd.f32 %v2630_v63, %v1221_v61 }
 0x2fd   : > { %v1250_v0 = vadd.f32 %v2631_v60, %v1249_v62 }
 0x2fe   : > { %v1281_v6 = vpack.c.bf16 %v1222_v2, %v1222_v2  ;;  %v1277_v16 = vpop.f32.mrf.mxu2 }
 0x2ff   : > { %v1282_v1 = vpack.c.bf16 %v1250_v0, %v1250_v0  ;;  %v1278_v24 = vadd.f32 %v2632_v23, %v1277_v16 }
 0x301   : > { %v1288_v3 = vsel %vm1283_vm9, %v1282_v1, 0  ;;  %v1315_v25 = vpack.c.bf16 %v1278_v24, %v1278_v24 }
 0x302   : > { %1297 = vmatpush.bf16.xpose.msra.mxu3 %v1288_v3  ;;  %v2526_v3 = vld [vmem:[%s3413_s25 + $0x28] sm:$0xff] }
 0x303   : > { %v1223_v4 = vpop.f32.mrf.mxu0  ;;  %v1321_v26 = vsel %vm1319_vm10, %v1315_v25, 0 }
 0x304   : > { %v1251_v5 = vpop.f32.mrf.mxu1  ;;  %1330 = vmatpush.bf16.msrb.mxu0 %v1321_v26  ;;  %v2525_v4 = vld [vmem:[%s3413_s25 + $0x20] sm:$0xff] }
 0x305   : > { %v2518_v5 = vld [vmem:[%s3412_s1 + $0x28] sm:$0xff] }
 0x306   : > { %v1279_v20 = vpop.f32.mrf.mxu2 }
 0x309   : > { %2374 = vmatmul.msk.bf16.vlgmr.msra.gmra.mxu3 %vm1283_vm9, %v1281_v6  ;;  %v2517_v6 = vld [vmem:[%s3412_s1 + $0x20] sm:$0xff] }
 0x30a   : > { %1414 = vmatpush.bf16.msrb.mxu3 %v2532_v35  ;;  %v2638_v35 = vld [vmem:[%s3018_s7 + $0x2] ss:$0 sm:$0xff] }
 0x30c   : > { %v1361_v32 = vpop.f32.mrf.mxu1 }
 0x30d   : > { %v1362_v42 = vadd.f32 %v2634_v41, %v1361_v32 }
 0x30e   : > { %v1389_v27 = vpop.f32.mrf.mxu2  ;;  %1415 = vmatpush.bf16.msrb.mxu3 %v2531_v36 }
 0x30f   : > { %v1390_v29 = vadd.f32 %v2633_v28, %v1389_v27  ;;  %v1421_v43 = vpack.c.bf16 %v1362_v42, %v1362_v42  ;;  %v2534_v28 = vld [vmem:[%s3013_s9 + $0x28] sm:$0xff] }
 0x311   : > { %v1422_v30 = vpack.c.bf16 %v1390_v29, %v1390_v29  ;;  %v2533_v29 = vld [vmem:[%s3013_s9 + $0x20] sm:$0xff] }
 0x312   : > { %1507 = vmatpush.bf16.msra.mxu3 %v1498_v45 }
 0x313   : > { %v1427_v31 = vsel %vm1283_vm9, %v1422_v30, 0 }
 0x314   : > { %1436 = vmatpush.bf16.xpose.msra.mxu0 %v1427_v31  ;;  %v1363_v34 = vpop.f32.mrf.mxu1 }
 0x315   : > { %v2528_v34 = vld [vmem:[%s3413_s25 + $0x38] sm:$0xff] }
 0x316   : > { %v1391_v33 = vpop.f32.mrf.mxu2 }
 0x319   : > { %2402 = vmatmul.msk.bf16.vlgmr.msrb.gmra.mxu3 %vm1208_vm8, %v3098_v59 }
 0x38c   : > { %v1299_v10 = vpop.f32.mrf.mxu3 }
 0x38d   : > { %v1303_v11 = vsel %vm1283_vm9, %v1299_v10, -inf }
 0x38e   : > { %1304 = vmax.xlane.f32.xlu0 %v1303_v11  ;;  %v1178_v11 = vld [vmem:[%s3024_s30 + $0x4] sm:$0xf] }
 0x394   : > { %v1301_v12 = vpop.f32.mrf.mxu3 }
 0x395   : > { %v1479_v12 = vsel %vm1319_vm10, %v1178_v11, 0 }
 0x396   : > { %1488 = vmatpush.bf16.msra.mxu2 %v1479_v12 }
 0x39a   : > { %1590 = vmatpush.bf16.msrb.mxu2 %v2534_v28 }
 0x39c   : > { %v1417_v47 = vpop.f32.mrf.mxu3 }
 0x39d   : > { %v1418_v49 = vadd.f32 %v2635_v46, %v1417_v47  ;;  %v2527_v46 = vld [vmem:[%s3413_s25 + $0x30] sm:$0xff]  ;;  %v2520_v47 = vld [vmem:[%s3412_s1 + $0x38] sm:$0xff] }
 0x39e   : > { %1591 = vmatpush.bf16.msrb.mxu2 %v2533_v29 }
 0x39f   : > { %v1454_v51 = vpack.c.bf16 %v1418_v49, %v1418_v49  ;;  %v1179_v49 = vld [vmem:[%s3024_s30 + $0x8] sm:$0xf] }
 0x3a1   : > { %v1459_v52 = vsel %vm1319_vm10, %v1454_v51, 0 }
 0x3a2   : > { %1468 = vmatpush.bf16.msra.mxu1 %v1459_v52 }
 0x3a4   : > { %v1419_v53 = vpop.f32.mrf.mxu3 }
 0x3a6   : > { %1562 = vmatpush.bf16.msrb.mxu1 %v2526_v3 }
 0x3aa   : > { %1563 = vmatpush.bf16.msrb.mxu1 %v2525_v4  ;;  %v2640_v4 = vld [vmem:[%s3415_s22 + $0x3] ss:$0 sm:$0xff] }
 0x401   : > { %v1305_v17 = vpop.xlane.xlu0 %1304 }
 0x402   : > { %v1306_v18 = vsub.f32 %v1299_v10, %v1305_v17 }
 0x404   : > { %v1307_v19 = vmul.f32 1.442695, %v1306_v18  ;;  %v2636_v18 = vld [vmem:[%s3414_s27 + $0x2] ss:$0 sm:$0xff] }
 0x406   : > { %2649 = vpow2.f32 %v1307_v19 }
 0x40c   : > { %v2650_v21 = vpop.eup %2649 }
 0x40d   : > { %v1309_v22 = vsel %vm1283_vm9, %v2650_v21, 0.0 }
 0x40e   : > { %1310 = vadd.xlane.f32.xlu0 %v1309_v22 }
 0x481   : > { %v1311_v37 = vpop.xlane.xlu0 %1310 }
 0x482   : > { %2651 = vrcp.f32 %v1311_v37 }
 0x488   : > { %v2652_v38 = vpop.eup %2651 }
 0x489   : > { %v1313_v39 = vmul.f32 %v2652_v38, %v2650_v21  ;;  %v2637_v21 = vld [vmem:[%s3415_s22 + $0x2] ss:$0 sm:$0xff]  ;;  %s3420_s22 = sld [smem:[#allocation9_spill]] }
 0x48b   : > { %v1314_v40 = vpack.c.bf16 %v1313_v39, %v1313_v39 }
 0x48d   : > { %2375 = vmatmul.msk.bf16.vlgmr.msrb.gmra.mxu0 %vm1283_vm9, %v1314_v40 }
 0x48e   : > { %1534 = vmatpush.bf16.msrb.mxu0 %v2518_v5 }
 0x48f   : > { %p2493_p1 = scmp.ne.s32.totalorder %s3420_s22, 1 }
 0x490   : > { %s3422_s28 = sld [smem:[#allocation40_spill]] (!%p2493_p1) }
 0x492   : > { %1535 = vmatpush.bf16.msrb.mxu0 %v2517_v6 }
 0x49d   : > { %2403 = vmatmul.msk.bf16.vlgmr.msra.gmra.mxu0 %vm1283_vm9, %v1421_v43 }
 0x4ad   : > { %2415 = vmatmul.msk.bf16.vlgmr.msrb.gmra.mxu0 %vm1208_vm8, %v3098_v59 }
 0x50a   : > { %v1332_v48 = vpop.f32.mrf.mxu0 }
 0x50b   : > { %v1336_v50 = vpack.c.bf16 %v1332_v48, %v1332_v48  ;;  %v2519_v48 = vld [vmem:[%s3412_s1 + $0x30] sm:$0xff] }
 0x50d   : > { %2406 = vmatmul.msk.bf16.vlgmr.msra.gmra.mxu3 %vm1283_vm9, %v1336_v50  ;;  %v1655_v50 = vsel %vm1319_vm10, %v1179_v49, 0 }
 0x512   : > { %v1334_v54 = vpop.f32.mrf.mxu0 }
 0x51a   : > { %v1438_v55 = vpop.f32.mrf.mxu0 }
 0x51b   : > { %v1442_v56 = vsel %vm1283_vm9, %v1438_v55, -inf }
 0x51c   : > { %1443 = vmax.xlane.f32.xlu1 %v1442_v56 }
 0x522   : > { %v1440_v57 = vpop.f32.mrf.mxu0 }
 0x52a   : > { %v1537_v13 = vpop.f32.mrf.mxu0 }
 0x52b   : > { %v1538_v24 = vadd.f32 %v2637_v21, %v1537_v13 }
 0x52d   : > { %v1597_v26 = vpack.c.bf16 %v1538_v24, %v1538_v24 }
 0x532   : > { %v1539_v14 = vpop.f32.mrf.mxu0 }
 0x58f   : > { %v1444_v60 = vpop.xlane.xlu1 %1443 }
 0x590   : > { %v1445_v61 = vsub.f32 %v1438_v55, %v1444_v60  ;;  %v3139_v62 = vpop.f32.mrf.mxu3  ;;  %v2639_v55 = vld [vmem:[%s3414_s27 + $0x3] ss:$0 sm:$0xff] }
 0x592   : > { %v1446_v63 = vmul.f32 1.442695, %v1445_v61 }
 0x594   : > { %2653 = vpow2.f32 %v1446_v63 }
 0x598   : > { %v1511_v0 = vpop.f32.mrf.mxu3 }
 0x59a   : > { %v2654_v1 = vpop.eup %2653 }
 0x59b   : > { %v1448_v2 = vsel %vm1283_vm9, %v2654_v1, 0.0 }
 0x59c   : > { %1449 = vadd.xlane.f32.xlu1 %v1448_v2 }
 0x60f   : > { %v1450_v7 = vpop.xlane.xlu1 %1449 }
 0x610   : > { %2655 = vrcp.f32 %v1450_v7 }
 0x616   : > { %v2656_v8 = vpop.eup %2655 }
 0x617   : > { %v1452_v9 = vmul.f32 %v2656_v8, %v2654_v1  ;;  %v2536_v8 = vld [vmem:[%s3013_s9 + $0x38] sm:$0xff] }
 0x619   : > { %v1453_v10 = vpack.c.bf16 %v1452_v9, %v1452_v9  ;;  %v2535_v9 = vld [vmem:[%s3013_s9 + $0x30] sm:$0xff] }
 0x61b   : > { %2404 = vmatmul.msk.bf16.vlgmr.msra.gmra.mxu1 %vm1283_vm9, %v1453_v10 }
 0x61c   : > { %1664 = vmatpush.bf16.msra.mxu1 %v1655_v50 }
 0x62b   : > { %2424 = vmatmul.msk.bf16.vlgmr.msrb.gmra.mxu1 %vm1208_vm8, %v3098_v59 }
 0x698   : > { %v1470_v15 = vpop.f32.mrf.mxu1 }
 0x699   : > { %v1474_v16 = vpack.c.bf16 %v1470_v15, %v1470_v15 }
 0x69b   : > { %2405 = vmatmul.msk.bf16.vlgmr.msra.gmra.mxu2 %vm1283_vm9, %v1474_v16 }
 0x69c   : > { %1692 = vmatpush.bf16.msra.mxu2 %v2520_v47 }
 0x6a0   : > { %v1472_v17 = vpop.f32.mrf.mxu1  ;;  %1693 = vmatpush.bf16.msra.mxu2 %v2519_v48 }
 0x6a1   : > { %v2641_v17 = vld [vmem:[%s3018_s7 + $0x3] ss:$0 sm:$0xff] }
 0x6a8   : > { %v1565_v19 = vpop.f32.mrf.mxu1 }
 0x6a9   : > { %v1566_v20 = vadd.f32 %v2636_v18, %v1565_v19 }
 0x6ab   : > { %v1598_v22 = vpack.c.bf16 %v1566_v20, %v1566_v20  ;;  %2433 = vmatmul.msk.bf16.vlgmr.msrb.gmra.mxu2 %vm1208_vm8, %v3098_v59 }
 0x6ad   : > { %v1603_v23 = vsel %vm1283_vm9, %v1598_v22, 0 }
 0x6ae   : > { %1612 = vmatpush.bf16.xpose.msrb.mxu3 %v1603_v23 }
 0x6b0   : > { %v1567_v25 = vpop.f32.mrf.mxu1 }
 0x6b5   : > { %2434 = vmatmul.msk.bf16.vlgmr.msrb.gmra.mxu3 %vm1283_vm9, %v1597_v26  ;;  %v1180_v26 = vld [vmem:[%s3024_s30 + $0xc] sm:$0xf] }
 0x6b6   : > { %1720 = vmatpush.bf16.msra.mxu3 %v2528_v34 }
 0x6ba   : > { %1721 = vmatpush.bf16.msra.mxu3 %v2527_v46 }
 0x6bb   : > { %2445 = vmatmul.msk.bf16.vlgmr.msra.gmra.mxu2 %vm1208_vm8, %v3098_v59 }
 0x6c5   : > { %2454 = vmatmul.msk.bf16.vlgmr.msra.gmra.mxu3 %vm1208_vm8, %v3098_v59 }
 0x71e   : > { %v3158_v27 = vpop.f32.mrf.mxu2 }
 0x71f   : > { %v1510_v10 = vadd.f32 %v3139_v62, %v3158_v27  ;;  %v1813_v27 = vsel %vm1319_vm10, %v1180_v26, 0 }
 0x720   : > { %1822 = vmatpush.bf16.msrb.mxu3 %v1813_v27 }
 0x726   : > { %v1492_v30 = vpop.f32.mrf.mxu2 }
 0x72e   : > { %v1593_v36 = vpop.f32.mrf.mxu2 }
 0x72f   : > { %v1594_v38 = vadd.f32 %v2638_v35, %v1593_v36  ;;  %v2642_v35 = vld [vmem:[%s3416_s23] ss:$0 sm:$0xff]  ;;  %s3421_s23 = sld [smem:[#allocation39_spill]] (!%p2493_p1) }
 0x731   : > { %v1630_v40 = vpack.c.bf16 %v1594_v38, %v1594_v38 }
 0x733   : > { %v1635_v42 = vsel %vm1319_vm10, %v1630_v40, 0 }
 0x734   : > { %1644 = vmatpush.bf16.msra.mxu0 %v1635_v42  ;;  %v2773_v42 = vmov 32.0  }
 0x736   : > { %v1595_v43 = vpop.f32.mrf.mxu2 }
 0x738   : > { %v1614_v31 = vpop.f32.mrf.mxu3  ;;  %1748 = vmatpush.bf16.msrb.mxu0 %v2536_v8 }
 0x739   : > { %v1618_v32 = vsel %vm1283_vm9, %v1614_v31, -inf }
 0x73a   : > { %1619 = vmax.xlane.f32.xlu2 %v1618_v32 }
 0x73c   : > { %1749 = vmatpush.bf16.msrb.mxu0 %v2535_v9 }
 0x73e   : > { %v1695_v0 = vpop.f32.mrf.mxu2 }
 0x73f   : > { %v1696_v6 = vadd.f32 %v2640_v4, %v1695_v0 }
 0x740   : > { %v1616_v33 = vpop.f32.mrf.mxu3 }
 0x741   : > { %v1755_v7 = vpack.c.bf16 %v1696_v6, %v1696_v6 }
 0x746   : > { %v1697_v1 = vpop.f32.mrf.mxu2 }
 0x748   : > { %v1723_v56 = vpop.f32.mrf.mxu3 }
 0x749   : > { %v1724_v57 = vadd.f32 %v2639_v55, %v1723_v56 }
 0x74b   : > { %v1756_v60 = vpack.c.bf16 %v1724_v57, %v1724_v57 }
 0x74d   : > { %v1761_v61 = vsel %vm1283_vm9, %v1756_v60, 0 }
 0x74e   : > { %1770 = vmatpush.bf16.xpose.msrb.mxu1 %v1761_v61 }
 0x750   : > { %v1725_v63 = vpop.f32.mrf.mxu3 }
 0x7ad   : > { %v1620_v37 = vpop.xlane.xlu2 %1619 }
 0x7ae   : > { %v1621_v39 = vsub.f32 %v1614_v31, %v1620_v37 }
 0x7b0   : > { %v1622_v41 = vmul.f32 1.442695, %v1621_v39 }
 0x7b2   : > { %2657 = vpow2.f32 %v1622_v41 }
 0x7b8   : > { %v2658_v44 = vpop.eup %2657 }
 0x7b9   : > { %v1624_v45 = vsel %vm1283_vm9, %v2658_v44, 0.0 }
 0x7ba   : > { %1625 = vadd.xlane.f32.xlu2 %v1624_v45 }
 0x82d   : > { %v1626_v51 = vpop.xlane.xlu2 %1625 }
 0x82e   : > { %2659 = vrcp.f32 %v1626_v51 }
 0x834   : > { %v2660_v52 = vpop.eup %2659 }
 0x835   : > { %v1628_v53 = vmul.f32 %v2660_v52, %v2658_v44 }
 0x837   : > { %v1629_v54 = vpack.c.bf16 %v1628_v53, %v1628_v53  ;;  %v2538_v53 = vld [vmem:[%s3041_s11 + $0x8] sm:$0xff] }
 0x839   : > { %2435 = vmatmul.msk.bf16.vlgmr.msra.gmra.mxu0 %vm1283_vm9, %v1629_v54  ;;  %v2537_v54 = vld [vmem:[%s3041_s11] sm:$0xff]  ;;  %s3417_s11 = scalar_lea.vmem %s3326_s15, %s2983_s29 }
 0x83a   : > { %1904 = vmatpush.bf16.msra.mxu0 %v2538_v53 }
 0x83e   : > { %1905 = vmatpush.bf16.msra.mxu0 %v2537_v54 }
 0x849   : > { %2463 = vmatmul.msk.bf16.vlgmr.msrb.gmra.mxu0 %vm1208_vm8, %v3098_v59 }
 0x8b6   : > { %v1646_v2 = vpop.f32.mrf.mxu0 }
 0x8b7   : > { %v1650_v3 = vpack.c.bf16 %v1646_v2, %v1646_v2 }
 0x8b9   : > { %2436 = vmatmul.msk.bf16.vlgmr.msra.gmra.mxu1 %vm1283_vm9, %v1650_v3  ;;  %v2643_v3 = vld [vmem:[%s3417_s11] ss:$0 sm:$0xff] }
 0x8be   : > { %v1648_v5 = vpop.f32.mrf.mxu0 }
 0x8bf   : > { %v2644_v5 = vld [vmem:[%s3418_s24] ss:$0 sm:$0xff] }
 0x8c6   : > { %v1751_v18 = vpop.f32.mrf.mxu0 }
 0x8c7   : > { %v1752_v19 = vadd.f32 %v2641_v17, %v1751_v18  ;;  %v2540_v18 = vld [vmem:[%s3055_s6 + $0x8] sm:$0xff] }
 0x8c9   : > { %2464 = vmatmul.msk.bf16.vlgmr.msrb.gmra.mxu1 %vm1283_vm9, %v1755_v7  ;;  %v1788_v20 = vpack.c.bf16 %v1752_v19, %v1752_v19 }
 0x8cb   : > { %v1793_v21 = vsel %vm1319_vm10, %v1788_v20, 0 }
 0x8cc   : > { %1802 = vmatpush.bf16.msrb.mxu2 %v1793_v21  ;;  %v2539_v21 = vld [vmem:[%s3055_s6] sm:$0xff] }
 0x8ce   : > { %v1753_v23 = vpop.f32.mrf.mxu0 }
 0x936   : > { %v1666_v11 = vpop.f32.mrf.mxu1 }
 0x937   : > { %v1670_v12 = vadd.f32 %v1666_v11, %v1510_v10  ;;  %v2645_v10 = vld [vmem:[%s1026_s12] ss:$0 sm:$0xff]  ;;  %v2542_v11 = vld [vmem:[%s3055_s6 + $0x18] sm:$0xff] }
 0x938   : > { %1982 = vmatpush.bf16.msra.mxu1 %v2542_v11 }
 0x93e   : > { %v1668_v13 = vpop.f32.mrf.mxu1 }
 0x946   : > { %v1772_v14 = vpop.f32.mrf.mxu1 }
 0x947   : > { %v1776_v15 = vsel %vm1283_vm9, %v1772_v14, -inf }
 0x948   : > { %1777 = vmax.xlane.f32.xlu0 %v1776_v15  ;;  %v2541_v15 = vld [vmem:[%s3055_s6 + $0x10] sm:$0xff] }
 0x949   : > { %1983 = vmatpush.bf16.msra.mxu1 %v2541_v15 }
 0x94d   : > { %1984 = vmatpush.bf16.msra.mxu1 %v2540_v18 }
 0x94e   : > { %v1774_v16 = vpop.f32.mrf.mxu1 }
 0x951   : > { %1985 = vmatpush.bf16.msra.mxu1 %v2539_v21 }
 0x9bb   : > { %v1778_v62 = vpop.xlane.xlu0 %1777 }
 0x9bc   : > { %v1779_v22 = vsub.f32 %v1772_v14, %v1778_v62 }
 0x9be   : > { %v1780_v24 = vmul.f32 1.442695, %v1779_v22 }
 0x9c0   : > { %2661 = vpow2.f32 %v1780_v24 }
 0x9c6   : > { %v2662_v59 = vpop.eup %2661 }
 0x9c7   : > { %v1782_v25 = vsel %vm1283_vm9, %v2662_v59, 0.0 }
 0x9c8   : > { %1783 = vadd.xlane.f32.xlu1 %v1782_v25 }
 0xa3b   : > { %v1784_v28 = vpop.xlane.xlu1 %1783 }
 0xa3c   : > { %2663 = vrcp.f32 %v1784_v28 }
 0xa3d   : > { %2665 = vrcp.f32 %v2773_v42 }
 0xa42   : > { %v2664_v29 = vpop.eup %2663 }
 0xa43   : > { %v1786_v30 = vmul.f32 %v2664_v29, %v2662_v59  ;;  %v2666_v43 = vpop.eup %2665 }
 0xa44   : > { %v1841_v44 = vmul.f32 32.0, %v2666_v43  ;;  %vm1845_vm11 = vweird.f32 %v2666_v43 }
 0xa45   : > { %v1787_v31 = vpack.c.bf16 %v1786_v30, %v1786_v30 }
 0xa46   : > { %v1842_v45 = vsub.f32 1.0, %v1841_v44 }
 0xa47   : > { %2465 = vmatmul.msk.bf16.vlgmr.msrb.gmra.mxu2 %vm1283_vm9, %v1787_v31 }
 0xa48   : > { %v1843_v46 = vmul.f32 %v2666_v43, %v1842_v45 }
 0xa4a   : > { %v1844_v47 = vadd.f32 %v2666_v43, %v1843_v46 }
 0xa4c   : > { %v3205_v48 = vsel %vm1845_vm11, %v2666_v43, %v1844_v47  ;;  %v2646_v43 = vld [vmem:[%s1034_s10] ss:$0 sm:$0xff] }
 0xaca   : > { %v1804_v32 = vpop.f32.mrf.mxu2 }
 0xacb   : > { %v1808_v33 = vpack.c.bf16 %v1804_v32, %v1804_v32 }
 0xacd   : > { %2466 = vmatmul.msk.bf16.vlgmr.msrb.gmra.mxu3 %vm1283_vm9, %v1808_v33 }
 0xad2   : > { %v1806_v34 = vpop.f32.mrf.mxu2 }
 0xb50   : > { %v1824_v36 = vpop.f32.mrf.mxu3 }
 0xb51   : > { %v1828_v37 = vadd.f32 %v1824_v36, %v1670_v12  ;;  %v2774_v36 = vmov 1.0  }
 0xb53   : > { %v1833_v38 = vadd.f32 %v2642_v35, %v1828_v37 }
 0xb55   : > { %v1834_v39 = vadd.f32 %v1833_v38, %v3094_v58 }
 0xb57   : > { %v1837_v40 = vsel %vm1208_vm8, %v1834_v39, 0.0 }
 0xb58   : > { %1838 = vadd.xlane.f32.xlu2 %v1837_v40  ;;  %v1826_v41 = vpop.f32.mrf.mxu3 }
 0xbcb   : > { %v1839_v49 = vpop.xlane.xlu2 %1838 }
 0xbcc   : > { %v1847_v50 = vmul.f32 %v3205_v48, %v1839_v49 }
 0xbce   : > { %v1848_v58 = vsub.f32 %v1834_v39, %v1847_v50 }
 0xbd0   : > { %v1849_v51 = vmul.f32 %v1848_v58, %v1848_v58 }
 0xbd2   : > { %v1850_v52 = vsel %vm1208_vm8, %v1849_v51, 0.0 }
 0xbd3   : > { %1851 = vadd.xlane.f32.xlu0 %v1850_v52 }
 0xc46   : > { %v1852_v55 = vpop.xlane.xlu0 %1851 }
 0xc47   : > { %v1853_v56 = vmul.f32 %v1852_v55, %v3205_v48 }
 0xc49   : > { %v1854_v57 = vadd.f32 1e-12, %v1853_v56 }
 0xc4b   : > { %2667 = vrsqrt.f32 %v1854_v57  ;;  %vm1861_vm13 = vweird.f32 %v1854_v57 }
 0xc51   : > { %v2668_v60 = vpop.eup %2667 }
 0xc52   : > { %v1856_v61 = vmul.f32 %v2668_v60, %v1854_v57  ;;  %vm1862_vm12 = vweird.f32 %v2668_v60 }
 0xc53   : > { %vm1863_vm14 = vmor %vm1861_vm13, %vm1862_vm12 }
 0xc54   : > { %v1857_v63 = vmul.f32 %v2668_v60, %v1856_v61 }
 0xc56   : > { %v1858_v0 = vmul.f32 0.5, %v1857_v63 }
 0xc58   : > { %v1859_v1 = vsub.f32 1.5, %v1858_v0 }
 0xc5a   : > { %v1860_v2 = vmul.f32 %v2668_v60, %v1859_v1 }
 0xc5c   : > { %v1864_v4 = vsel %vm1863_vm14, %v2668_v60, %v1860_v2  ;;  %v2647_v2 = vld [vmem:[%s1037_s2] ss:$0 sm:$0xff] }
 0xc5d   : > { %v1865_v6 = vmul.f32 %v1864_v4, %v1848_v58 }
 0xc5f   : > { %v1869_v7 = vmul.f32 %v2643_v3, %v1865_v6 }
 0xc61   : > { %v1873_v8 = vadd.f32 %v2644_v5, %v1869_v7 }
 0xc63   : > { %v1874_v9 = vpack.c.bf16 %v1873_v8, %v1873_v8 }
 0xc65   : > { %2475 = vmatmul.msk.bf16.vlgmr.msra.gmra.mxu0 %vm1208_vm8, %v1874_v9 }
 0xce2   : > { %v1907_v12 = vpop.f32.mrf.mxu0 }
 0xce3   : > { %v1908_v13 = vadd.f32 %v2645_v10, %v1907_v12 }
 0xce5   : > { %v1912_v14 = vmul.f32 0.70710677, %v1908_v13  ;;  %v1911_v39 = vmul.f32 0.5, %v1908_v13 }
 0xce7   : > { %v1915_v16 = vand.u32 2147483647, %v1912_v14  ;;  %vm1913_vm15 = vcmp.lt.f32.partialorder %v1912_v14, 0.0 }
 0xce8   : > { %v1914_v37 = vsel %vm1913_vm15, -1.0, %v2774_v36 }
 0xce9   : > { %v1916_v17 = vmul.f32 0.3275911, %v1915_v16  ;;  %v1928_v22 = vsub.f32 0.0, %v1915_v16 }
 0xcea   : > { %v1909_v19 = vpop.f32.mrf.mxu0 }
 0xceb   : > { %v1917_v20 = vadd.f32 1.0, %v1916_v17  ;;  %v1929_v59 = vmul.f32 %v1928_v22, %v1915_v16 }
 0xced   : > { %2669 = vrcp.f32 %v1917_v20  ;;  %v1930_v27 = vmul.f32 1.442695, %v1929_v59 }
 0xcef   : > { %2671 = vpow2.f32 %v1930_v27 }
 0xcf3   : > { %v2670_v62 = vpop.eup %2669 }
 0xcf4   : > { %v1919_v23 = vmul.f32 1.0614054, %v2670_v62 }
 0xcf5   : > { %v2672_v33 = vpop.eup %2671 }
 0xcf6   : > { %v1920_v24 = vadd.f32 -1.4531521, %v1919_v23 }
 0xcf8   : > { %v1921_v25 = vmul.f32 %v2670_v62, %v1920_v24 }
 0xcfa   : > { %v1922_v26 = vadd.f32 1.4214138, %v1921_v25 }
 0xcfc   : > { %v1923_v28 = vmul.f32 %v2670_v62, %v1922_v26 }
 0xcfe   : > { %v1924_v29 = vadd.f32 -0.28449672, %v1923_v28 }
 0xd00   : > { %v1925_v30 = vmul.f32 %v2670_v62, %v1924_v29 }
 0xd02   : > { %v1926_v31 = vadd.f32 0.2548296, %v1925_v30 }
 0xd04   : > { %v1927_v32 = vmul.f32 %v2670_v62, %v1926_v31 }
 0xd06   : > { %v1932_v34 = vmul.f32 %v2672_v33, %v1927_v32 }
 0xd08   : > { %v1933_v35 = vsub.f32 1.0, %v1932_v34 }
 0xd0a   : > { %v1934_v38 = vmul.f32 %v1933_v35, %v1914_v37 }
 0xd0c   : > { %v1935_v40 = vadd.f32 1.0, %v1934_v38 }
 0xd0e   : > { %v1936_v41 = vmul.f32 %v1935_v40, %v1911_v39 }
 0xd10   : > { %v1937_v42 = vpack.c.bf16 %v1936_v41, %v1936_v41 }
 0xd12   : > { %2492 = vmatmul.msk.bf16.vlgmr.msra.gmra.mxu1 %vm1974_vm0, %v1937_v42 }
 0xd8f   : > { %v1987_v44 = vpop.f32.mrf.mxu1 }
 0xd90   : > { %v1988_v45 = vadd.f32 %v2646_v43, %v1987_v44 }
 0xd92   : > { %v1991_v46 = vadd.f32 %v1988_v45, %v1873_v8 }
 0xd94   : > { %v1994_v47 = vsel %vm1208_vm8, %v1991_v46, 0.0 }
 0xd95   : > { %1995 = vadd.xlane.f32.xlu1 %v1994_v47 }
 0xd97   : > { %v1989_v49 = vpop.f32.mrf.mxu1 }
 0xe08   : > { %v1996_v50 = vpop.xlane.xlu1 %1995 }
 0xe09   : > { %v1997_v58 = vmul.f32 %v1996_v50, %v3205_v48 }
 0xe0b   : > { %v1998_v51 = vsub.f32 %v1991_v46, %v1997_v58 }
 0xe0d   : > { %v1999_v52 = vmul.f32 %v1998_v51, %v1998_v51 }
 0xe0f   : > { %v2000_v53 = vsel %vm1208_vm8, %v1999_v52, 0.0 }
 0xe10   : > { %2001 = vadd.xlane.f32.xlu2 %v2000_v53 }
 0xe83   : > { %v2002_v54 = vpop.xlane.xlu2 %2001 }
 0xe84   : > { %v2003_v55 = vmul.f32 %v2002_v54, %v3205_v48  ;;  %v2648_v48 = vld [vmem:[%s1040_s17] ss:$0 sm:$0xff] }
 0xe86   : > { %v2004_v56 = vadd.f32 1e-12, %v2003_v55 }
 0xe88   : > { %2673 = vrsqrt.f32 %v2004_v56  ;;  %vm2011_vm2 = vweird.f32 %v2004_v56 }
 0xe8e   : > { %v2674_v57 = vpop.eup %2673 }
 0xe8f   : > { %v2006_v60 = vmul.f32 %v2674_v57, %v2004_v56  ;;  %vm2012_vm1 = vweird.f32 %v2674_v57 }
 0xe90   : > { %vm2013_vm3 = vmor %vm2011_vm2, %vm2012_vm1 }
 0xe91   : > { %v2007_v61 = vmul.f32 %v2674_v57, %v2006_v60 }
 0xe93   : > { %v2008_v63 = vmul.f32 0.5, %v2007_v61 }
 0xe95   : > { %v2009_v0 = vsub.f32 1.5, %v2008_v63 }
 0xe97   : > { %v2010_v1 = vmul.f32 %v2674_v57, %v2009_v0 }
 0xe99   : > { %v2014_v3 = vsel %vm2013_vm3, %v2674_v57, %v2010_v1 }
 0xe9a   : > { %v2015_v4 = vmul.f32 %v2014_v3, %v1998_v51 }
 0xe9c   : > { %v2019_v5 = vmul.f32 %v2647_v2, %v2015_v4  ;;  %2028 = sbr.rel (%p2493_p1) target bundleno = 3887 (0xf2f), region = 128 }
 0xe9e   : > { %v2023_v6 = vadd.f32 %v2648_v48, %v2019_v5 }
 0xea0   : > { %2024 = vst.msk [vmem:[#allocation2] sm:$0xff] %vm1208_vm8, %v2023_v6 }
 0xea1   : > { %v2544_v7 = vld [vmem:[%s3421_s23 + $0x8] sm:$0xff]  ;;  %v2543_v8 = vld [vmem:[%s3421_s23] sm:$0xff]  ;;  %v2029_v9 = vpack.c.bf16 %v2023_v6, %v2023_v6 }
 0xea2   : > { %2059 = vmatpush.bf16.msra.mxu0 %v2544_v7  ;;  %v2675_v10 = vld [vmem:[%s3422_s28] ss:$0 sm:$0xff] }
 0xea6   : > { %2060 = vmatpush.bf16.msra.mxu0 %v2543_v8 }
 0xea9   : > { %2502 = vmatmul.msk.bf16.vlgmr.msra.gmra.mxu0 %vm1208_vm8, %v2029_v9 }
 0xf26   : > { %v2062_v11 = vpop.f32.mrf.mxu0 }
 0xf27   : > { %v2063_v12 = vadd.f32 %v2675_v10, %v2062_v11 }
 0xf29   : > { %2066 = vst [vmem:[%s973_s5] sm:$0xff] %v2063_v12 }
 0xf2e   : > { %v2064_v13 = vpop.f32.mrf.mxu0 }
 0xf2f PF: > { %s3423_s11 = sld [smem:[#allocation10_spill]]  ;;  %s2080_s10 = sshll.u32 %s973_s5, 4  ;;  %s2081_s10 = int_to_ptr.vmem [resolvable:$true] %s2080_s10 }
 0xf30   : > { %s3424_s13 = sld [smem:[#allocation7_spill]] }
 0xf31   : > { %s3426_s12 = sld [smem:[#allocation41_spill]] }
 0xf35   : > { %s2504_s24 = sshll.u32 %s3423_s11, 3 }
 0xf36   : > { %s3427_s1 = sand.u32 1, %s3424_s13  }
 0xf37   : > { %s2078_s6 = scalar_lea.hbm %s3426_s12, %s2504_s24  ;;  %s2068_s25 = scalar_lea.sflag [#allocation4], %s3427_s1 }
 0xf38   : > { %s2082_s26 = sshll.u32 %s2078_s6, 4  ;;  %s2696_s2 = scalar_lea.hbm %s3426_s12, 16  ;;  %s2083_s26 = int_to_ptr.hbm [resolvable:$true] %s2082_s26 }
 0xf39   : > { %s2690_s27 = sshra.s32 %s2083_s26, 4  ;;  %s2691_s27 = int_to_ptr.hbm [resolvable:$true] %s2690_s27 }
 0xf3a   : > { %s2692_s22 = scalar_lea.hbm %s2691_s27, 8  ;;  %p2697_p6 = scmp.lt.s32.totalorder %s2691_s27, %s3426_s12 }
 0xf3b   : > { %p2693_p2 = scmp.ne.s32.totalorder %s2691_s27, %s2692_s22  ;;  %p2698_p7 = scmp.lt.s32.totalorder %s2696_s2, %s2692_s22 }
 0xf3d   : > { %p2694_p4 = pnand %p2693_p2, %p2954_p3  ;;  %p2699_p8 = por %p2698_p7, %p2697_p6 }
 0xf3f   : > { %p2695_p5 = pneg %p2694_p4 }
 0xf41   : > { %p2700_p10 = pnand %p2699_p8, %p2695_p5 }
 0xf43   : > { %2703 = shalt.err (!%p2700_p10)
}
 0xf44   : > { %2545 = dma.vmem_to_hbm [thread:$0]  (%p2954_p3), %s2081_s10, 128, %s2083_s26, %s2068_s25  }
 0xf45 PF: > { %s3428_s3 = sld [smem:[#allocation13_spill]] }
 0xf46   : > { %s3429_s5 = sld [smem:[#allocation6_spill]] }
 0xf4b   : > { %p2551_p11 = scmp.ge.s32.totalorder %s3428_s3, 2 }
 0xf4c   : > { %s2094_s28 = sand.u32 1, %s3429_s5  }
 0xf4d   : > { %p2548_p12 = pnand %p2551_p11, %p2964_p9  ;;  %s2095_s11 = scalar_lea.sflag [#allocation4], %s2094_s28 }
 0xf4f   : > { %p2549_p13 = pneg %p2548_p12 }
 0xf51   : > { %2737 = dma.done.wait (%p2549_p13), %s2095_s11, 128  }
 0xf52   : > { %2739 = vsyncadd (%p2549_p13), %s2095_s11, 4294967168  ;;  %s38_s1 = sadd.s32 1, %s3428_s3   ;;  %s3431_s29 = sld [smem:[#allocation7_spill]] }
 0xf53   : > { %p35_p0 = scmp.ge.s32.totalorder %s38_s1, 6   ;;  %s3432_s2 = sld [smem:[#allocation8_spill]] }
 0xf54   : > { %s3433_s6 = sld [smem:[#allocation18_spill]] }
 0xf55   : > { %s3434_s30 = sld [smem:[#allocation11_spill]]  ;;  %37 = sbr.rel (!%p35_p0) target bundleno = 25 (0x19), region = 211 }
 0xf56   : > { %s3435_s7 = sld [smem:[#allocation12_spill]] }
 0xf57   : > { %s3436_s3 = sld [smem:[#allocation14_spill]] }
 0xf58   : > { %s3437_s26 = sld [smem:[#allocation16_spill]] }
 0xf5a   :  { %2101 = vsyncpa [#allocation4], 1 }
 0xf5b   :  { %2103 = vsyncpa [#allocation4 + $0x1], 1 }

</bundles_post_ra>
